<compile_context>
chip_gen: v5e
topology: v5e:2x2
jax: 0.10.0
libtpu: 0.0.40
codegen_flags: <defaults>
</compile_context>

<pallas_src>
import functools

import jax
import jax.numpy as jnp
from jax.experimental import pallas as pl
from jax.experimental.pallas import tpu as pltpu


def _pick_heads_per_group(num_heads: int, head_dim: int) -> int:
    """Smallest divisor of num_heads whose group width (hg * hd) reaches 128 lanes."""
    for hg in range(1, num_heads + 1):
        if num_heads % hg == 0 and hg * head_dim >= 128:
            return hg
    return num_heads  # model is narrower than 128 lanes; one group of all heads


def _attention_kernel(x_ref, wqkv_ref, wproj_ref, bias_ref, o_ref, ctx_ref, *,
                      num_groups: int, heads_per_group: int, head_dim: int):
    """One (batch, head_group) grid step.

    Refs (VMEM tiles):
      x_ref:     (1, N, C)          tokens for this batch element (resident across groups)
      wqkv_ref:  (G, C, 3*hd_grp)   fused [Wq*scale | Wk | Wv] per group, grid-resident
      wproj_ref: (G, hd_grp, C)     pre-transposed proj-weight row groups, grid-resident
      bias_ref:  (1, C)             proj bias, grid-resident
      o_ref:     (1, N, C)          output block (same block index across the group axis)
      ctx_ref:   (G, N, hd_grp)     staging buffer for per-group attention context
    """
    g = pl.program_id(1)
    hd_grp = heads_per_group * head_dim
    dt = x_ref.dtype

    x = x_ref[0]                                                       # (N, C)

    # Fused QKV projection for this head group: one wide matmul, f32 accumulate.
    # The softmax scale is pre-folded into the Wq columns on the host.
    qkv = jnp.dot(x, wqkv_ref[g],
                  preferred_element_type=jnp.float32).astype(dt)       # (N, 3*hd_grp)

    # Per-head attention (statically unrolled; heads_per_group is 2-4 for real
    # DINOv2 shapes).  Every op stays 2-D.
    # TODO(synk): is_causal=True masking path not implemented (module default False).
    for i in range(heads_per_group):
        q_i = qkv[:, i * head_dim:(i + 1) * head_dim]                  # (N, hd), pre-scaled
        k_i = qkv[:, hd_grp + i * head_dim: hd_grp + (i + 1) * head_dim]
        v_i = qkv[:, 2 * hd_grp + i * head_dim: 2 * hd_grp + (i + 1) * head_dim]

        # q @ k^T without materializing a transpose (contract the last dims).
        s = jax.lax.dot_general(q_i, k_i, (((1,), (1,)), ((), ())),
                                preferred_element_type=jnp.float32)    # (N, N)
        s = s - jnp.max(s, axis=-1, keepdims=True)
        # Note: on v6e/v7x at large N a bf16 exp would relieve the EUP; kept f32
        # here (v5e-safe, exact-ish demo numerics).
        p = jnp.exp(s)
        p = p * pl.reciprocal(jnp.sum(p, axis=-1, keepdims=True), approx=True)

        ctx_i = jnp.dot(p.astype(dt), v_i,
                        preferred_element_type=jnp.float32)            # (N, hd)
        # Stage this head's context at its column offset inside the group slab.
        ctx_ref[g, :, i * head_dim:(i + 1) * head_dim] = ctx_i.astype(ctx_ref.dtype)

    # Output projection once every head group has been staged: no f32 (N, C)
    # accumulator read-modify-write across grid steps, good contraction width.
    @pl.when(g == num_groups - 1)
    def _finalize():
        acc = jnp.dot(ctx_ref[0], wproj_ref[0],
                      preferred_element_type=jnp.float32)              # (N, C)
        for gg in range(1, num_groups):
            acc = acc + jnp.dot(ctx_ref[gg], wproj_ref[gg],
                                preferred_element_type=jnp.float32)
        acc = acc + bias_ref[...].astype(jnp.float32)
        o_ref[0] = acc.astype(o_ref.dtype)


def prepare_attention_weights(wqkv, wproj, bproj, *, num_heads: int,
                              heads_per_group=None):
    """One-time host-side weight re-layout (hoist out of the per-call path).

    nn.Linear stores W as (out, in) with y = x @ W.T; we pre-transpose, fold the
    softmax scale into Wq, fuse Q/K/V per head group and split the proj weight
    by group so the kernel never transposes or re-lays-out a weight.
    """
    three_c, C = wqkv.shape
    assert three_c == 3 * C and C % num_heads == 0
    head_dim = C // num_heads
    if heads_per_group is None:
        heads_per_group = _pick_heads_per_group(num_heads, head_dim)
    assert num_heads % heads_per_group == 0
    num_groups = num_heads // heads_per_group
    hd_grp = heads_per_group * head_dim
    scale = head_dim ** -0.5

    wqkv_t = wqkv.T                                        # (C, 3C); y = x @ w
    wq = wqkv_t[:, 0 * C:1 * C] * scale                    # fold softmax scale into Wq
    wk = wqkv_t[:, 1 * C:2 * C]
    wv = wqkv_t[:, 2 * C:3 * C]

    def per_group(w):                                      # (C, C) -> (G, C, hd_grp)
        return w.reshape(C, num_groups, hd_grp).transpose(1, 0, 2)

    wqkv_fused = jnp.concatenate(
        [per_group(wq), per_group(wk), per_group(wv)], axis=-1)        # (G, C, 3*hd_grp)
    wproj_grouped = wproj.T.reshape(num_groups, hd_grp, C)             # (G, hd_grp, C)
    bias2d = bproj.reshape(1, C)
    return wqkv_fused, wproj_grouped, bias2d, heads_per_group


def attention_forward(x, wqkv_fused, wproj_grouped, bias2d, *, num_heads: int,
                      heads_per_group: int):
    """Forward of dinov2 Attention (qkv_bias=False, proj_bias=True, eval mode)."""
    B, N, C = x.shape
    head_dim = C // num_heads
    num_groups = num_heads // heads_per_group
    hd_grp = heads_per_group * head_dim
    assert wqkv_fused.shape == (num_groups, C, 3 * hd_grp)
    assert wproj_grouped.shape == (num_groups, hd_grp, C)

    kernel = functools.partial(_attention_kernel, num_groups=num_groups,
                               heads_per_group=heads_per_group, head_dim=head_dim)

    itemsize = jnp.dtype(x.dtype).itemsize
    # Rough VMEM budget: resident weights + double-buffered x/out blocks +
    # context staging scratch + in-flight f32 scores / qkv / proj accumulator.
    est = (4 * C * C + C) * itemsize                 # resident weights + bias
    est += 4 * N * C * itemsize                      # x and out blocks (double-buffered)
    est += N * C * itemsize                          # ctx staging scratch
    est += (heads_per_group * N * N + N * 3 * hd_grp + N * C) * 4
    vmem_limit = int(min(max(32 * 1024 * 1024, 2 * est), 64 * 1024 * 1024))
    # TODO(synk): for high-resolution N (~1370) add a query-tile grid axis
    # (flash-style) so the (N, N) score tiles stay within v7x / v5e budgets.

    return pl.pallas_call(
        kernel,
        out_shape=jax.ShapeDtypeStruct((B, N, C), x.dtype),
        grid_spec=pltpu.PrefetchScalarGridSpec(
            num_scalar_prefetch=0,
            grid=(B, num_groups),
            in_specs=[
                # x: one batch element, resident across the head-group axis.
                pl.BlockSpec((1, N, C), lambda b, g: (b, 0, 0)),
                # Weights / bias: full blocks + constant index maps -> DMA'd
                # once and grid-resident (no per-batch re-fetch).
                pl.BlockSpec((num_groups, C, 3 * hd_grp), lambda b, g: (0, 0, 0)),
                pl.BlockSpec((num_groups, hd_grp, C), lambda b, g: (0, 0, 0)),
                pl.BlockSpec((1, C), lambda b, g: (0, 0)),
            ],
            out_specs=pl.BlockSpec((1, N, C), lambda b, g: (b, 0, 0)),
            scratch_shapes=[pltpu.VMEM((num_groups, N, hd_grp), x.dtype)],
        ),
        compiler_params=pltpu.CompilerParams(
            # TODO(synk): for B == 1 on v7x, split the query axis into a leading
            # "parallel" dimension so both TensorCores get work.
            dimension_semantics=("parallel", "arbitrary"),
            vmem_limit_bytes=vmem_limit,
        ),
    )(x, wqkv_fused, wproj_grouped, bias2d)


def attention_reference(x, wqkv, wproj, bproj, *, num_heads: int):
    """Pure-JAX reference mirroring the PyTorch forward."""
    B, N, C = x.shape
    hd = C // num_heads
    qkv = jnp.einsum("bnc,oc->bno", x, wqkv)                       # (B, N, 3C)
    qkv = qkv.reshape(B, N, 3, num_heads, hd)
    q, k, v = qkv[:, :, 0], qkv[:, :, 1], qkv[:, :, 2]             # (B, N, H, hd)
    q, k, v = [jnp.transpose(t, (0, 2, 1, 3)) for t in (q, k, v)]  # (B, H, N, hd)
    s = jnp.einsum("bhqd,bhkd->bhqk", q, k) * (hd ** -0.5)
    p = jax.nn.softmax(s, axis=-1)
    o = jnp.einsum("bhqk,bhkd->bhqd", p, v)                        # (B, H, N, hd)
    o = jnp.transpose(o, (0, 2, 1, 3)).reshape(B, N, C)
    return jnp.einsum("bnc,oc->bno", o, wproj) + bproj


if __name__ == "__main__":
    # Small shapes consistent with the module: dim=64, num_heads=8 -> head_dim=8.
    B, N, C, H = 2, 16, 64, 8

    key = jax.random.PRNGKey(0)
    kx, kqkv, kproj, kbias = jax.random.split(key, 4)

    x = jax.random.normal(kx, (B, N, C), dtype=jnp.float32)

    # Weight init matching Attention.init_weights: normal(std=dim**-0.5);
    # small nonzero proj bias to exercise the proj_bias=True path.
    init_std = C ** -0.5
    wqkv = jax.random.normal(kqkv, (3 * C, C), dtype=jnp.float32) * init_std  # qkv_bias=False
    wproj = jax.random.normal(kproj, (C, C), dtype=jnp.float32) * init_std
    bproj = jax.random.normal(kbias, (C,), dtype=jnp.float32) * 0.1

    # One-time weight re-layout, hoisted out of the per-call path.
    wqkv_fused, wproj_grouped, bias2d, hg = prepare_attention_weights(
        wqkv, wproj, bproj, num_heads=H)

    out = attention_forward(x, wqkv_fused, wproj_grouped, bias2d,
                            num_heads=H, heads_per_group=hg)
    out = jax.block_until_ready(out)

    ref = attention_reference(x, wqkv, wproj, bproj, num_heads=H)
    assert out.shape == (B, N, C)
    # Tolerance slightly relaxed vs exact math because the softmax row-sum uses
    # the hardware approximate reciprocal (pl.reciprocal(..., approx=True)).
    assert jnp.allclose(out, ref, atol=5e-3, rtol=5e-3), "mismatch vs reference"

    print("KERNEL_OK")
</pallas_src>

<mosaic_0001>
module attributes {stable_mosaic.version = 11 : i64} {
  func.func @_attention_kernel(%arg0: i32, %arg1: i32, %arg2: memref<1x16x64xf32, #tpu.memory_space<vmem>>, %arg3: memref<1x64x192xf32, #tpu.memory_space<vmem>>, %arg4: memref<1x64x64xf32, #tpu.memory_space<vmem>>, %arg5: memref<1x64xf32, #tpu.memory_space<vmem>>, %arg6: memref<1x16x64xf32, #tpu.memory_space<vmem>>, %arg7: memref<1x16x64xf32, #tpu.memory_space<vmem>>) attributes {dimension_semantics = [#tpu.dimension_semantics<parallel>, #tpu.dimension_semantics<arbitrary>], iteration_bounds = array<i64: 2, 1>, scalar_prefetch = 0 : i64, scratch_operands = 1 : i64, tpu.core_type = #tpu.core_type<tc>, window_params = [{transform_indices = @transform_0, window_bounds = array<i64: 1, 16, 64>}, {pipeline_mode = #tpu.pipeline_mode<synchronous>, transform_indices = @transform_1, window_bounds = array<i64: 1, 64, 192>}, {pipeline_mode = #tpu.pipeline_mode<synchronous>, transform_indices = @transform_2, window_bounds = array<i64: 1, 64, 64>}, {pipeline_mode = #tpu.pipeline_mode<synchronous>, transform_indices = @transform_3, window_bounds = array<i64: 1, 64>}, {transform_indices = @transform_4, window_bounds = array<i64: 1, 16, 64>}]} {
    %c0 = arith.constant 0 : index
    %c0_0 = arith.constant 0 : index
    %c0_1 = arith.constant 0 : index
    %0 = vector.load %arg2[%c0, %c0_0, %c0_1] : memref<1x16x64xf32, #tpu.memory_space<vmem>>, vector<1x16x64xf32>
    %1 = vector.shape_cast %0 : vector<1x16x64xf32> to vector<16x64xf32>
    %2 = arith.index_cast %arg1 : i32 to index
    %c0_2 = arith.constant 0 : index
    %c0_3 = arith.constant 0 : index
    %3 = vector.load %arg3[%2, %c0_2, %c0_3] : memref<1x64x192xf32, #tpu.memory_space<vmem>>, vector<1x64x192xf32>
    %4 = vector.shape_cast %3 : vector<1x64x192xf32> to vector<64x192xf32>
    %cst = arith.constant dense<0.000000e+00> : vector<16x192xf32>
    %5 = tpu.matmul %1, %4, %cst {dimension_numbers = #tpu.dot_dimension_numbers<[1], [0], [0], [1], [0, 0, 1, 1], [], []>} : vector<16x64xf32>, vector<64x192xf32>, vector<16x192xf32> -> vector<16x192xf32>
    %6 = vector.extract_strided_slice %5 {offsets = [0, 0], sizes = [16, 8], strides = [1, 1]} : vector<16x192xf32> to vector<16x8xf32>
    %7 = vector.extract_strided_slice %5 {offsets = [0, 64], sizes = [16, 8], strides = [1, 1]} : vector<16x192xf32> to vector<16x8xf32>
    %8 = vector.extract_strided_slice %5 {offsets = [0, 128], sizes = [16, 8], strides = [1, 1]} : vector<16x192xf32> to vector<16x8xf32>
    %cst_4 = arith.constant dense<0.000000e+00> : vector<16x16xf32>
    %9 = tpu.matmul %6, %7, %cst_4 {dimension_numbers = #tpu.dot_dimension_numbers<[1], [1], [0], [0], [0, 0, 1, 0], [], []>} : vector<16x8xf32>, vector<16x8xf32>, vector<16x16xf32> -> vector<16x16xf32>
    %cst_5 = arith.constant dense<0xFF800000> : vector<16xf32>
    %10 = vector.multi_reduction <maximumf>, %9, %cst_5 [1] : vector<16x16xf32> to vector<16xf32>
    %11 = vector.shape_cast %10 : vector<16xf32> to vector<16x1xf32>
    %12 = vector.broadcast %11 : vector<16x1xf32> to vector<16x16xf32>
    %13 = arith.subf %9, %12 : vector<16x16xf32>
    %14 = math.exp %13 : vector<16x16xf32>
    %cst_6 = arith.constant dense<0.000000e+00> : vector<16xf32>
    %15 = vector.multi_reduction <add>, %14, %cst_6 [1] : vector<16x16xf32> to vector<16xf32>
    %16 = vector.shape_cast %15 : vector<16xf32> to vector<16x1xf32>
    %17 = tpu.reciprocal %16 {approx = true} : vector<16x1xf32> -> vector<16x1xf32>
    %18 = vector.broadcast %17 : vector<16x1xf32> to vector<16x16xf32>
    %19 = arith.mulf %14, %18 : vector<16x16xf32>
    %cst_7 = arith.constant dense<0.000000e+00> : vector<16x8xf32>
    %20 = tpu.matmul %19, %8, %cst_7 {dimension_numbers = #tpu.dot_dimension_numbers<[1], [0], [0], [1], [0, 0, 1, 1], [], []>} : vector<16x16xf32>, vector<16x8xf32>, vector<16x8xf32> -> vector<16x8xf32>
    %21 = arith.index_cast %arg1 : i32 to index
    %c0_8 = arith.constant 0 : index
    %c0_9 = arith.constant 0 : index
    %22 = vector.load %arg7[%21, %c0_8, %c0_9] : memref<1x16x64xf32, #tpu.memory_space<vmem>>, vector<1x16x8xf32>
    %23 = vector.shape_cast %22 : vector<1x16x8xf32> to vector<16x8xf32>
    %24 = vector.shape_cast %20 : vector<16x8xf32> to vector<1x16x8xf32>
    tpu.vector_store %arg7[%21, %c0_8, %c0_9], %24 {strides = array<i32>} : memref<1x16x64xf32, #tpu.memory_space<vmem>>, vector<1x16x8xf32>,
    %25 = vector.extract_strided_slice %5 {offsets = [0, 8], sizes = [16, 8], strides = [1, 1]} : vector<16x192xf32> to vector<16x8xf32>
    %26 = vector.extract_strided_slice %5 {offsets = [0, 72], sizes = [16, 8], strides = [1, 1]} : vector<16x192xf32> to vector<16x8xf32>
    %27 = vector.extract_strided_slice %5 {offsets = [0, 136], sizes = [16, 8], strides = [1, 1]} : vector<16x192xf32> to vector<16x8xf32>
    %cst_10 = arith.constant dense<0.000000e+00> : vector<16x16xf32>
    %28 = tpu.matmul %25, %26, %cst_10 {dimension_numbers = #tpu.dot_dimension_numbers<[1], [1], [0], [0], [0, 0, 1, 0], [], []>} : vector<16x8xf32>, vector<16x8xf32>, vector<16x16xf32> -> vector<16x16xf32>
    %cst_11 = arith.constant dense<0xFF800000> : vector<16xf32>
    %29 = vector.multi_reduction <maximumf>, %28, %cst_11 [1] : vector<16x16xf32> to vector<16xf32>
    %30 = vector.shape_cast %29 : vector<16xf32> to vector<16x1xf32>
    %31 = vector.broadcast %30 : vector<16x1xf32> to vector<16x16xf32>
    %32 = arith.subf %28, %31 : vector<16x16xf32>
    %33 = math.exp %32 : vector<16x16xf32>
    %cst_12 = arith.constant dense<0.000000e+00> : vector<16xf32>
    %34 = vector.multi_reduction <add>, %33, %cst_12 [1] : vector<16x16xf32> to vector<16xf32>
    %35 = vector.shape_cast %34 : vector<16xf32> to vector<16x1xf32>
    %36 = tpu.reciprocal %35 {approx = true} : vector<16x1xf32> -> vector<16x1xf32>
    %37 = vector.broadcast %36 : vector<16x1xf32> to vector<16x16xf32>
    %38 = arith.mulf %33, %37 : vector<16x16xf32>
    %cst_13 = arith.constant dense<0.000000e+00> : vector<16x8xf32>
    %39 = tpu.matmul %38, %27, %cst_13 {dimension_numbers = #tpu.dot_dimension_numbers<[1], [0], [0], [1], [0, 0, 1, 1], [], []>} : vector<16x16xf32>, vector<16x8xf32>, vector<16x8xf32> -> vector<16x8xf32>
    %40 = arith.index_cast %arg1 : i32 to index
    %c0_14 = arith.constant 0 : index
    %c8 = arith.constant 8 : index
    %41 = vector.load %arg7[%40, %c0_14, %c8] : memref<1x16x64xf32, #tpu.memory_space<vmem>>, vector<1x16x8xf32>
    %42 = vector.shape_cast %41 : vector<1x16x8xf32> to vector<16x8xf32>
    %43 = vector.shape_cast %39 : vector<16x8xf32> to vector<1x16x8xf32>
    tpu.vector_store %arg7[%40, %c0_14, %c8], %43 {strides = array<i32>} : memref<1x16x64xf32, #tpu.memory_space<vmem>>, vector<1x16x8xf32>,
    %44 = vector.extract_strided_slice %5 {offsets = [0, 16], sizes = [16, 8], strides = [1, 1]} : vector<16x192xf32> to vector<16x8xf32>
    %45 = vector.extract_strided_slice %5 {offsets = [0, 80], sizes = [16, 8], strides = [1, 1]} : vector<16x192xf32> to vector<16x8xf32>
    %46 = vector.extract_strided_slice %5 {offsets = [0, 144], sizes = [16, 8], strides = [1, 1]} : vector<16x192xf32> to vector<16x8xf32>
    %cst_15 = arith.constant dense<0.000000e+00> : vector<16x16xf32>
    %47 = tpu.matmul %44, %45, %cst_15 {dimension_numbers = #tpu.dot_dimension_numbers<[1], [1], [0], [0], [0, 0, 1, 0], [], []>} : vector<16x8xf32>, vector<16x8xf32>, vector<16x16xf32> -> vector<16x16xf32>
    %cst_16 = arith.constant dense<0xFF800000> : vector<16xf32>
    %48 = vector.multi_reduction <maximumf>, %47, %cst_16 [1] : vector<16x16xf32> to vector<16xf32>
    %49 = vector.shape_cast %48 : vector<16xf32> to vector<16x1xf32>
    %50 = vector.broadcast %49 : vector<16x1xf32> to vector<16x16xf32>
    %51 = arith.subf %47, %50 : vector<16x16xf32>
    %52 = math.exp %51 : vector<16x16xf32>
    %cst_17 = arith.constant dense<0.000000e+00> : vector<16xf32>
    %53 = vector.multi_reduction <add>, %52, %cst_17 [1] : vector<16x16xf32> to vector<16xf32>
    %54 = vector.shape_cast %53 : vector<16xf32> to vector<16x1xf32>
    %55 = tpu.reciprocal %54 {approx = true} : vector<16x1xf32> -> vector<16x1xf32>
    %56 = vector.broadcast %55 : vector<16x1xf32> to vector<16x16xf32>
    %57 = arith.mulf %52, %56 : vector<16x16xf32>
    %cst_18 = arith.constant dense<0.000000e+00> : vector<16x8xf32>
    %58 = tpu.matmul %57, %46, %cst_18 {dimension_numbers = #tpu.dot_dimension_numbers<[1], [0], [0], [1], [0, 0, 1, 1], [], []>} : vector<16x16xf32>, vector<16x8xf32>, vector<16x8xf32> -> vector<16x8xf32>
    %59 = arith.index_cast %arg1 : i32 to index
    %c0_19 = arith.constant 0 : index
    %c16 = arith.constant 16 : index
    %60 = vector.load %arg7[%59, %c0_19, %c16] : memref<1x16x64xf32, #tpu.memory_space<vmem>>, vector<1x16x8xf32>
    %61 = vector.shape_cast %60 : vector<1x16x8xf32> to vector<16x8xf32>
    %62 = vector.shape_cast %58 : vector<16x8xf32> to vector<1x16x8xf32>
    tpu.vector_store %arg7[%59, %c0_19, %c16], %62 {strides = array<i32>} : memref<1x16x64xf32, #tpu.memory_space<vmem>>, vector<1x16x8xf32>,
    %63 = vector.extract_strided_slice %5 {offsets = [0, 24], sizes = [16, 8], strides = [1, 1]} : vector<16x192xf32> to vector<16x8xf32>
    %64 = vector.extract_strided_slice %5 {offsets = [0, 88], sizes = [16, 8], strides = [1, 1]} : vector<16x192xf32> to vector<16x8xf32>
    %65 = vector.extract_strided_slice %5 {offsets = [0, 152], sizes = [16, 8], strides = [1, 1]} : vector<16x192xf32> to vector<16x8xf32>
    %cst_20 = arith.constant dense<0.000000e+00> : vector<16x16xf32>
    %66 = tpu.matmul %63, %64, %cst_20 {dimension_numbers = #tpu.dot_dimension_numbers<[1], [1], [0], [0], [0, 0, 1, 0], [], []>} : vector<16x8xf32>, vector<16x8xf32>, vector<16x16xf32> -> vector<16x16xf32>
    %cst_21 = arith.constant dense<0xFF800000> : vector<16xf32>
    %67 = vector.multi_reduction <maximumf>, %66, %cst_21 [1] : vector<16x16xf32> to vector<16xf32>
    %68 = vector.shape_cast %67 : vector<16xf32> to vector<16x1xf32>
    %69 = vector.broadcast %68 : vector<16x1xf32> to vector<16x16xf32>
    %70 = arith.subf %66, %69 : vector<16x16xf32>
    %71 = math.exp %70 : vector<16x16xf32>
    %cst_22 = arith.constant dense<0.000000e+00> : vector<16xf32>
    %72 = vector.multi_reduction <add>, %71, %cst_22 [1] : vector<16x16xf32> to vector<16xf32>
    %73 = vector.shape_cast %72 : vector<16xf32> to vector<16x1xf32>
    %74 = tpu.reciprocal %73 {approx = true} : vector<16x1xf32> -> vector<16x1xf32>
    %75 = vector.broadcast %74 : vector<16x1xf32> to vector<16x16xf32>
    %76 = arith.mulf %71, %75 : vector<16x16xf32>
    %cst_23 = arith.constant dense<0.000000e+00> : vector<16x8xf32>
    %77 = tpu.matmul %76, %65, %cst_23 {dimension_numbers = #tpu.dot_dimension_numbers<[1], [0], [0], [1], [0, 0, 1, 1], [], []>} : vector<16x16xf32>, vector<16x8xf32>, vector<16x8xf32> -> vector<16x8xf32>
    %78 = arith.index_cast %arg1 : i32 to index
    %c0_24 = arith.constant 0 : index
    %c24 = arith.constant 24 : index
    %79 = vector.load %arg7[%78, %c0_24, %c24] : memref<1x16x64xf32, #tpu.memory_space<vmem>>, vector<1x16x8xf32>
    %80 = vector.shape_cast %79 : vector<1x16x8xf32> to vector<16x8xf32>
    %81 = vector.shape_cast %77 : vector<16x8xf32> to vector<1x16x8xf32>
    tpu.vector_store %arg7[%78, %c0_24, %c24], %81 {strides = array<i32>} : memref<1x16x64xf32, #tpu.memory_space<vmem>>, vector<1x16x8xf32>,
    %82 = vector.extract_strided_slice %5 {offsets = [0, 32], sizes = [16, 8], strides = [1, 1]} : vector<16x192xf32> to vector<16x8xf32>
    %83 = vector.extract_strided_slice %5 {offsets = [0, 96], sizes = [16, 8], strides = [1, 1]} : vector<16x192xf32> to vector<16x8xf32>
    %84 = vector.extract_strided_slice %5 {offsets = [0, 160], sizes = [16, 8], strides = [1, 1]} : vector<16x192xf32> to vector<16x8xf32>
    %cst_25 = arith.constant dense<0.000000e+00> : vector<16x16xf32>
    %85 = tpu.matmul %82, %83, %cst_25 {dimension_numbers = #tpu.dot_dimension_numbers<[1], [1], [0], [0], [0, 0, 1, 0], [], []>} : vector<16x8xf32>, vector<16x8xf32>, vector<16x16xf32> -> vector<16x16xf32>
    %cst_26 = arith.constant dense<0xFF800000> : vector<16xf32>
    %86 = vector.multi_reduction <maximumf>, %85, %cst_26 [1] : vector<16x16xf32> to vector<16xf32>
    %87 = vector.shape_cast %86 : vector<16xf32> to vector<16x1xf32>
    %88 = vector.broadcast %87 : vector<16x1xf32> to vector<16x16xf32>
    %89 = arith.subf %85, %88 : vector<16x16xf32>
    %90 = math.exp %89 : vector<16x16xf32>
    %cst_27 = arith.constant dense<0.000000e+00> : vector<16xf32>
    %91 = vector.multi_reduction <add>, %90, %cst_27 [1] : vector<16x16xf32> to vector<16xf32>
    %92 = vector.shape_cast %91 : vector<16xf32> to vector<16x1xf32>
    %93 = tpu.reciprocal %92 {approx = true} : vector<16x1xf32> -> vector<16x1xf32>
    %94 = vector.broadcast %93 : vector<16x1xf32> to vector<16x16xf32>
    %95 = arith.mulf %90, %94 : vector<16x16xf32>
    %cst_28 = arith.constant dense<0.000000e+00> : vector<16x8xf32>
    %96 = tpu.matmul %95, %84, %cst_28 {dimension_numbers = #tpu.dot_dimension_numbers<[1], [0], [0], [1], [0, 0, 1, 1], [], []>} : vector<16x16xf32>, vector<16x8xf32>, vector<16x8xf32> -> vector<16x8xf32>
    %97 = arith.index_cast %arg1 : i32 to index
    %c0_29 = arith.constant 0 : index
    %c32 = arith.constant 32 : index
    %98 = vector.load %arg7[%97, %c0_29, %c32] : memref<1x16x64xf32, #tpu.memory_space<vmem>>, vector<1x16x8xf32>
    %99 = vector.shape_cast %98 : vector<1x16x8xf32> to vector<16x8xf32>
    %100 = vector.shape_cast %96 : vector<16x8xf32> to vector<1x16x8xf32>
    tpu.vector_store %arg7[%97, %c0_29, %c32], %100 {strides = array<i32>} : memref<1x16x64xf32, #tpu.memory_space<vmem>>, vector<1x16x8xf32>,
    %101 = vector.extract_strided_slice %5 {offsets = [0, 40], sizes = [16, 8], strides = [1, 1]} : vector<16x192xf32> to vector<16x8xf32>
    %102 = vector.extract_strided_slice %5 {offsets = [0, 104], sizes = [16, 8], strides = [1, 1]} : vector<16x192xf32> to vector<16x8xf32>
    %103 = vector.extract_strided_slice %5 {offsets = [0, 168], sizes = [16, 8], strides = [1, 1]} : vector<16x192xf32> to vector<16x8xf32>
    %cst_30 = arith.constant dense<0.000000e+00> : vector<16x16xf32>
    %104 = tpu.matmul %101, %102, %cst_30 {dimension_numbers = #tpu.dot_dimension_numbers<[1], [1], [0], [0], [0, 0, 1, 0], [], []>} : vector<16x8xf32>, vector<16x8xf32>, vector<16x16xf32> -> vector<16x16xf32>
    %cst_31 = arith.constant dense<0xFF800000> : vector<16xf32>
    %105 = vector.multi_reduction <maximumf>, %104, %cst_31 [1] : vector<16x16xf32> to vector<16xf32>
    %106 = vector.shape_cast %105 : vector<16xf32> to vector<16x1xf32>
    %107 = vector.broadcast %106 : vector<16x1xf32> to vector<16x16xf32>
    %108 = arith.subf %104, %107 : vector<16x16xf32>
    %109 = math.exp %108 : vector<16x16xf32>
    %cst_32 = arith.constant dense<0.000000e+00> : vector<16xf32>
    %110 = vector.multi_reduction <add>, %109, %cst_32 [1] : vector<16x16xf32> to vector<16xf32>
    %111 = vector.shape_cast %110 : vector<16xf32> to vector<16x1xf32>
    %112 = tpu.reciprocal %111 {approx = true} : vector<16x1xf32> -> vector<16x1xf32>
    %113 = vector.broadcast %112 : vector<16x1xf32> to vector<16x16xf32>
    %114 = arith.mulf %109, %113 : vector<16x16xf32>
    %cst_33 = arith.constant dense<0.000000e+00> : vector<16x8xf32>
    %115 = tpu.matmul %114, %103, %cst_33 {dimension_numbers = #tpu.dot_dimension_numbers<[1], [0], [0], [1], [0, 0, 1, 1], [], []>} : vector<16x16xf32>, vector<16x8xf32>, vector<16x8xf32> -> vector<16x8xf32>
    %116 = arith.index_cast %arg1 : i32 to index
    %c0_34 = arith.constant 0 : index
    %c40 = arith.constant 40 : index
    %117 = vector.load %arg7[%116, %c0_34, %c40] : memref<1x16x64xf32, #tpu.memory_space<vmem>>, vector<1x16x8xf32>
    %118 = vector.shape_cast %117 : vector<1x16x8xf32> to vector<16x8xf32>
    %119 = vector.shape_cast %115 : vector<16x8xf32> to vector<1x16x8xf32>
    tpu.vector_store %arg7[%116, %c0_34, %c40], %119 {strides = array<i32>} : memref<1x16x64xf32, #tpu.memory_space<vmem>>, vector<1x16x8xf32>,
    %120 = vector.extract_strided_slice %5 {offsets = [0, 48], sizes = [16, 8], strides = [1, 1]} : vector<16x192xf32> to vector<16x8xf32>
    %121 = vector.extract_strided_slice %5 {offsets = [0, 112], sizes = [16, 8], strides = [1, 1]} : vector<16x192xf32> to vector<16x8xf32>
    %122 = vector.extract_strided_slice %5 {offsets = [0, 176], sizes = [16, 8], strides = [1, 1]} : vector<16x192xf32> to vector<16x8xf32>
    %cst_35 = arith.constant dense<0.000000e+00> : vector<16x16xf32>
    %123 = tpu.matmul %120, %121, %cst_35 {dimension_numbers = #tpu.dot_dimension_numbers<[1], [1], [0], [0], [0, 0, 1, 0], [], []>} : vector<16x8xf32>, vector<16x8xf32>, vector<16x16xf32> -> vector<16x16xf32>
    %cst_36 = arith.constant dense<0xFF800000> : vector<16xf32>
    %124 = vector.multi_reduction <maximumf>, %123, %cst_36 [1] : vector<16x16xf32> to vector<16xf32>
    %125 = vector.shape_cast %124 : vector<16xf32> to vector<16x1xf32>
    %126 = vector.broadcast %125 : vector<16x1xf32> to vector<16x16xf32>
    %127 = arith.subf %123, %126 : vector<16x16xf32>
    %128 = math.exp %127 : vector<16x16xf32>
    %cst_37 = arith.constant dense<0.000000e+00> : vector<16xf32>
    %129 = vector.multi_reduction <add>, %128, %cst_37 [1] : vector<16x16xf32> to vector<16xf32>
    %130 = vector.shape_cast %129 : vector<16xf32> to vector<16x1xf32>
    %131 = tpu.reciprocal %130 {approx = true} : vector<16x1xf32> -> vector<16x1xf32>
    %132 = vector.broadcast %131 : vector<16x1xf32> to vector<16x16xf32>
    %133 = arith.mulf %128, %132 : vector<16x16xf32>
    %cst_38 = arith.constant dense<0.000000e+00> : vector<16x8xf32>
    %134 = tpu.matmul %133, %122, %cst_38 {dimension_numbers = #tpu.dot_dimension_numbers<[1], [0], [0], [1], [0, 0, 1, 1], [], []>} : vector<16x16xf32>, vector<16x8xf32>, vector<16x8xf32> -> vector<16x8xf32>
    %135 = arith.index_cast %arg1 : i32 to index
    %c0_39 = arith.constant 0 : index
    %c48 = arith.constant 48 : index
    %136 = vector.load %arg7[%135, %c0_39, %c48] : memref<1x16x64xf32, #tpu.memory_space<vmem>>, vector<1x16x8xf32>
    %137 = vector.shape_cast %136 : vector<1x16x8xf32> to vector<16x8xf32>
    %138 = vector.shape_cast %134 : vector<16x8xf32> to vector<1x16x8xf32>
    tpu.vector_store %arg7[%135, %c0_39, %c48], %138 {strides = array<i32>} : memref<1x16x64xf32, #tpu.memory_space<vmem>>, vector<1x16x8xf32>,
    %139 = vector.extract_strided_slice %5 {offsets = [0, 56], sizes = [16, 8], strides = [1, 1]} : vector<16x192xf32> to vector<16x8xf32>
    %140 = vector.extract_strided_slice %5 {offsets = [0, 120], sizes = [16, 8], strides = [1, 1]} : vector<16x192xf32> to vector<16x8xf32>
    %141 = vector.extract_strided_slice %5 {offsets = [0, 184], sizes = [16, 8], strides = [1, 1]} : vector<16x192xf32> to vector<16x8xf32>
    %cst_40 = arith.constant dense<0.000000e+00> : vector<16x16xf32>
    %142 = tpu.matmul %139, %140, %cst_40 {dimension_numbers = #tpu.dot_dimension_numbers<[1], [1], [0], [0], [0, 0, 1, 0], [], []>} : vector<16x8xf32>, vector<16x8xf32>, vector<16x16xf32> -> vector<16x16xf32>
    %cst_41 = arith.constant dense<0xFF800000> : vector<16xf32>
    %143 = vector.multi_reduction <maximumf>, %142, %cst_41 [1] : vector<16x16xf32> to vector<16xf32>
    %144 = vector.shape_cast %143 : vector<16xf32> to vector<16x1xf32>
    %145 = vector.broadcast %144 : vector<16x1xf32> to vector<16x16xf32>
    %146 = arith.subf %142, %145 : vector<16x16xf32>
    %147 = math.exp %146 : vector<16x16xf32>
    %cst_42 = arith.constant dense<0.000000e+00> : vector<16xf32>
    %148 = vector.multi_reduction <add>, %147, %cst_42 [1] : vector<16x16xf32> to vector<16xf32>
    %149 = vector.shape_cast %148 : vector<16xf32> to vector<16x1xf32>
    %150 = tpu.reciprocal %149 {approx = true} : vector<16x1xf32> -> vector<16x1xf32>
    %151 = vector.broadcast %150 : vector<16x1xf32> to vector<16x16xf32>
    %152 = arith.mulf %147, %151 : vector<16x16xf32>
    %cst_43 = arith.constant dense<0.000000e+00> : vector<16x8xf32>
    %153 = tpu.matmul %152, %141, %cst_43 {dimension_numbers = #tpu.dot_dimension_numbers<[1], [0], [0], [1], [0, 0, 1, 1], [], []>} : vector<16x16xf32>, vector<16x8xf32>, vector<16x8xf32> -> vector<16x8xf32>
    %154 = arith.index_cast %arg1 : i32 to index
    %c0_44 = arith.constant 0 : index
    %c56 = arith.constant 56 : index
    %155 = vector.load %arg7[%154, %c0_44, %c56] : memref<1x16x64xf32, #tpu.memory_space<vmem>>, vector<1x16x8xf32>
    %156 = vector.shape_cast %155 : vector<1x16x8xf32> to vector<16x8xf32>
    %157 = vector.shape_cast %153 : vector<16x8xf32> to vector<1x16x8xf32>
    tpu.vector_store %arg7[%154, %c0_44, %c56], %157 {strides = array<i32>} : memref<1x16x64xf32, #tpu.memory_space<vmem>>, vector<1x16x8xf32>,
    %c0_i32 = arith.constant 0 : i32
    %158 = arith.cmpi eq, %arg1, %c0_i32 : i32
    %159 = arith.extui %158 : i1 to i32
    %c0_i32_45 = arith.constant 0 : i32
    %160 = arith.cmpi ne, %159, %c0_i32_45 : i32
    scf.if %160 {
      %c0_46 = arith.constant 0 : index
      %c0_47 = arith.constant 0 : index
      %c0_48 = arith.constant 0 : index
      %161 = vector.load %arg7[%c0_46, %c0_47, %c0_48] : memref<1x16x64xf32, #tpu.memory_space<vmem>>, vector<1x16x64xf32>
      %162 = vector.shape_cast %161 : vector<1x16x64xf32> to vector<16x64xf32>
      %c0_49 = arith.constant 0 : index
      %c0_50 = arith.constant 0 : index
      %c0_51 = arith.constant 0 : index
      %163 = vector.load %arg4[%c0_49, %c0_50, %c0_51] : memref<1x64x64xf32, #tpu.memory_space<vmem>>, vector<1x64x64xf32>
      %164 = vector.shape_cast %163 : vector<1x64x64xf32> to vector<64x64xf32>
      %cst_52 = arith.constant dense<0.000000e+00> : vector<16x64xf32>
      %165 = tpu.matmul %162, %164, %cst_52 {dimension_numbers = #tpu.dot_dimension_numbers<[1], [0], [0], [1], [0, 0, 1, 1], [], []>} : vector<16x64xf32>, vector<64x64xf32>, vector<16x64xf32> -> vector<16x64xf32>
      %c0_53 = arith.constant 0 : index
      %c0_54 = arith.constant 0 : index
      %166 = vector.load %arg5[%c0_53, %c0_54] : memref<1x64xf32, #tpu.memory_space<vmem>>, vector<1x64xf32>
      %167 = vector.broadcast %166 : vector<1x64xf32> to vector<16x64xf32>
      %168 = arith.addf %165, %167 : vector<16x64xf32>
      %c0_55 = arith.constant 0 : index
      %c0_56 = arith.constant 0 : index
      %c0_57 = arith.constant 0 : index
      %169 = vector.load %arg6[%c0_55, %c0_56, %c0_57] : memref<1x16x64xf32, #tpu.memory_space<vmem>>, vector<1x16x64xf32>
      %170 = vector.shape_cast %169 : vector<1x16x64xf32> to vector<16x64xf32>
      %171 = vector.shape_cast %168 : vector<16x64xf32> to vector<1x16x64xf32>
      tpu.vector_store %arg6[%c0_55, %c0_56, %c0_57], %171 {strides = array<i32>} : memref<1x16x64xf32, #tpu.memory_space<vmem>>, vector<1x16x64xf32>,
    } else {
    }
    return
  }
  func.func @transform_0(%arg0: i32, %arg1: i32) -> (i32, i32, i32) {
    %c0_i32 = arith.constant 0 : i32
    %c0_i32_0 = arith.constant 0 : i32
    %c0_i32_1 = arith.constant 0 : i32
    return %arg0, %c0_i32, %c0_i32_0 : i32, i32, i32
  }
  func.func @transform_1(%arg0: i32, %arg1: i32) -> (i32, i32, i32) {
    %c0_i32 = arith.constant 0 : i32
    %c0_i32_0 = arith.constant 0 : i32
    %c0_i32_1 = arith.constant 0 : i32
    %c0_i32_2 = arith.constant 0 : i32
    return %c0_i32, %c0_i32_0, %c0_i32_1 : i32, i32, i32
  }
  func.func @transform_2(%arg0: i32, %arg1: i32) -> (i32, i32, i32) {
    %c0_i32 = arith.constant 0 : i32
    %c0_i32_0 = arith.constant 0 : i32
    %c0_i32_1 = arith.constant 0 : i32
    %c0_i32_2 = arith.constant 0 : i32
    return %c0_i32, %c0_i32_0, %c0_i32_1 : i32, i32, i32
  }
  func.func @transform_3(%arg0: i32, %arg1: i32) -> (i32, i32) {
    %c0_i32 = arith.constant 0 : i32
    %c0_i32_0 = arith.constant 0 : i32
    %c0_i32_1 = arith.constant 0 : i32
    return %c0_i32, %c0_i32_0 : i32, i32
  }
  func.func @transform_4(%arg0: i32, %arg1: i32) -> (i32, i32, i32) {
    %c0_i32 = arith.constant 0 : i32
    %c0_i32_0 = arith.constant 0 : i32
    %c0_i32_1 = arith.constant 0 : i32
    return %arg0, %c0_i32, %c0_i32_0 : i32, i32, i32
  }
}

</mosaic_0001>

<bundles_post_ra>
// kernel: tpu_custom_call.1
= control target key start
LH: loop header
LB: loop body
LE: loop exit
PB: predicated region body
PF: predicated region fallthrough
CT: control target
= control target key end

     0   :  { %s2324_s0 = inlined_call_operand.hbm [shape: f32[2,16,64], index: 0, kind: input, shape index: {}]   ;;  %s2325_s1 = inlined_call_operand.hbm [shape: f32[1,64,192], index: 1, kind: input, shape index: {}]   ;;  %s2326_s2 = inlined_call_operand.hbm [shape: f32[1,64,64], index: 2, kind: input, shape index: {}]   ;;  %s2327_s3 = inlined_call_operand.vmem [shape: f32[1,64], index: 3, kind: input, shape index: {}]   ;;  %s2328_s4 = inlined_call_operand.hbm [shape: f32[2,16,64], index: 4, kind: output, shape index: {}]  }
   0x1   :  { %2330 = sst [smem:[#allocation13_spill]] %s2325_s1 }
   0x2   :  { %9 = vsyncpa [#allocation4], 0 }
   0x3   :  { %11 = vsyncpa [#allocation4 + $0x1], 0 }
   0x4   :  { %12 = vsyncpa [#allocation7], 0 }
   0x5   :  { %13 = vsyncpa [#allocation5], 0 }
   0x6   :  { %15 = vsyncpa [#allocation5 + $0x1], 0  ;;  %s1855_s15 = smov 0   ;;  %s1857_s16 = smov 0  }
   0x7   :  { %s1859_s17 = smov 0   ;;  %s1861_s18 = smov 0  }
   0x8   :  { %s1863_s19 = smov 0   ;;  %s1865_s20 = smov 0  }
   0x9 LB: > { %s1350_s21 = sadd.s32 4294967295, %s1806_s20   ;;  %s1351_s22 = sadd.s32 4294967294, %s1806_s20   ;;  %s1806_s20 = sphi %s1865_s20, %s21_s20   ;;  %s1802_s19 = sphi %s1863_s19, %s2342_s19   ;;  %s1798_s18 = sphi %s1861_s18, %s2341_s18   ;;  %s1794_s17 = sphi %s1859_s17, %s2340_s17   ;;  %s1790_s16 = sphi %s1857_s16, %s2339_s16   ;;  %s1786_s15 = sphi %s1855_s15, %s2338_s15  }
   0xa   : > { %p53_p0 = scmp.ne.s32.totalorder %s1790_s16, %s1786_s15  ;;  %p1891_p1 = scmp.eq.s32.totalorder %s1350_s21, 0 }
   0xb   : > { %p146_p2 = scmp.eq.s32.totalorder %s1351_s22, 1  ;;  %p1352_p4 = scmp.ge.s32.totalorder %s1806_s20, 1 }
   0xc   : > { %p1897_p3 = por %p1891_p1, %p53_p0  ;;  %p153_p6 = scmp.lt.s32.totalorder %s1806_s20, 3 }
   0xd   : > { %p1902_p5 = por %p146_p2, %p53_p0  ;;  %s2334_s1 = sld [smem:[#allocation13_spill]] }
   0xe   : > { %p1910_p7 = pnand %p1352_p4, %p153_p6  ;;  %s1808_s30 = smov [#allocation6]  }
   0xf   : > { %s166_s5 = sshll.u32 %s1808_s30, 4  ;;  %p1355_p10 = scmp.ge.s32.totalorder %s1806_s20, 2  ;;  %s167_s5 = int_to_ptr.vmem [resolvable:$true] %s166_s5 }
  0x10   : > { %p1439_p8 = pneg %p1910_p7  ;;  %s178_s8 = sshll.u32 %s2326_s2, 4  ;;  %s179_s8 = int_to_ptr.hbm [resolvable:$true] %s178_s8 }
  0x11   : > { %s1809_s9 = smov 256   ;;  %s1810_s10 = smov 16  }
  0x12   : > { %p1440_p9 = pnand %p1439_p8, %p1891_p1  ;;  %s1811_s11 = smov [#allocation8]  }
  0x13   : > { %s164_s28 = sshll.u32 %s2334_s1, 4  ;;  %s180_s12 = sshll.u32 %s1811_s11, 4  ;;  %s165_s28 = int_to_ptr.hbm [resolvable:$true] %s164_s28  ;;  %s181_s12 = int_to_ptr.vmem [resolvable:$true] %s180_s12 }
  0x14   : > { %1442 = dma.hbm_to_vmem [thread:$0]  (!%p1440_p9), %s165_s28, 2048, %s167_s5, [#allocation7], %s1809_s9, %s1809_s9, %s1810_s10  }
  0x15   : > { %s2329_s13 = smov 128   ;;  %s1813_s14 = smov 8  }
  0x16   : > { %1445 = dma.hbm_to_vmem [thread:$0]  (!%p1440_p9), %s179_s8, 1024, %s181_s12, [#allocation7], %s2329_s13, %s2329_s13, %s1813_s14  }
  0x17   : > { %p140_p11 = scmp.eq.s32.totalorder %s1350_s21, 1  ;;  %s33_s22 = sadd.s32 1, %s1802_s19 }
  0x18   : > { %p35_p12 = scmp.ge.s32.totalorder %s33_s22, 2  ;;  %s40_s26 = sadd.s32 1, %s1794_s17 }
  0x19   : > { %p47_p13 = scmp.ne.s32.totalorder %s1794_s17, %s1790_s16  ;;  %p48_p0 = scmp.eq.s32.totalorder %s1806_s20, 0 }
  0x1a   : > { %s2344_s22 = smov (%p35_p12, %s33_s22), 0  ;;  %p1456_p4 = scmp.lt.s32.totalorder %s1806_s20, 2 }
  0x1b   : > { %p1934_p2 = por %p140_p11, %p47_p13  ;;  %s37_s28 = ssub.s32 %s1802_s19, %s2344_s22 }
  0x1c   : > { %s197_s30 = sand.u32 1, %s1794_s17   ;;  %p38_p6 = scmp.eq.s32.totalorder %s37_s28, 0 }
  0x1d   : > { %p49_p8 = por %p48_p0, %p47_p13  ;;  %s1356_s5 = sshll.u32 %s197_s30, 4 }
  0x1e   : > { %s1423_s21 = sshll.u32 %s1802_s19, 4  ;;  %s201_s11 = scalar_lea.vmem [#allocation3], %s1356_s5 }
  0x1f   : > { %s1944_s6 = scalar_select %p38_p6, %s1794_s17, %s40_s26  }
  0x20   : > { %s206_s9 = scalar_lea.hbm %s2324_s0, %s1423_s21  ;;  %s209_s12 = sshll.u32 %s201_s11, 4  ;;  %s210_s12 = int_to_ptr.vmem [resolvable:$true] %s209_s12 }
  0x21   : > { %s207_s10 = sshll.u32 %s206_s9, 4  ;;  %p1447_p9 = pnand %p1456_p4, %p49_p8  ;;  %s208_s10 = int_to_ptr.hbm [resolvable:$true] %s207_s10 }
  0x22   : > { %s198_s13 = scalar_lea.sflag [#allocation4], %s197_s30  ;;  %s2337_s1 = smov 128  }
  0x23   : > { %1449 = dma.hbm_to_vmem [thread:$0]  (!%p1447_p9), %s208_s10, 256, %s210_s12, %s198_s13, %s2337_s1, %s2337_s1, %s1813_s14  }
  0x24   : > { %221 = sbr.rel (%p1910_p7) target bundleno = 1733 (0x6c5), region = 36  ;;  %s1957_s26 = sand.u32 (!%p1910_p7), 1, %s1790_s16  }
  0x25   : > { %s1360_s28 = sshll.u32 (!%p1910_p7), %s1957_s26, 4  ;;  %s224_s5 = scalar_lea.sflag (!%p1910_p7), [#allocation4], %s1957_s26 }
  0x26   : > { %s1963_s21 = scalar_lea.vmem (!%p1910_p7), [#allocation3], %s1360_s28 }
  0x29   : > { %1773 = dma.done.wait (%p1897_p3), %s224_s5, 256  }
  0x2a   : > { %1775 = vsyncadd (%p1897_p3), %s224_s5, 4294967040 }
  0x2b   : > { %1777 = dma.done.wait (%p1891_p1), [#allocation7], 3072  }
  0x2c   : > { %1779 = vsyncadd (%p1891_p1), [#allocation7], 4294964224  ;;  %v282_v0 = vld [vmem:[#allocation6 + $0x70] sm:$0xff]  ;;  %v280_v1 = vld [vmem:[#allocation6 + $0x60] sm:$0xff]  ;;  %vm284_vm0 = vcmask 523264   ;;  %s1814_s1 = smov 120  }
  0x2d   : > { %299 = vmatpush.msra.mxu0 %v282_v0  ;;  %v278_v2 = vld [vmem:[#allocation6 + $0x50] sm:$0xff]  ;;  %v283_v3 = vld [vmem:[#allocation6 + $0x78] sm:$0xff]  ;;  %v281_v4 = vld [vmem:[#allocation6 + $0x68] sm:$0xff]  ;;  %s1815_s23 = smov 104   ;;  %s1816_s24 = smov 64   ;;  %vm343_vm1 = vcmask 64512  }
  0x2e   : > { %v276_v5 = vld [vmem:[#allocation6 + $0x40] sm:$0xff]  ;;  %322 = vmatpush.msra.mxu1 %v283_v3  ;;  %v279_v6 = vld [vmem:[#allocation6 + $0x58] sm:$0xff]  ;;  %v274_v7 = vld [vmem:[#allocation6 + $0x30] sm:$0xff]  ;;  %s1817_s29 = smov 56   ;;  %s1818_s13 = smov 40   ;;  %vm375_vm2 = vcmask 130048  }
  0x2f   : > { %300 = vmatpush.msra.mxu0 %v280_v1  ;;  %v277_v8 = vld [vmem:[#allocation6 + $0x48] sm:$0xff]  ;;  %v272_v9 = vld [vmem:[#allocation6 + $0x20] sm:$0xff]  ;;  %v275_v10 = vld [vmem:[#allocation6 + $0x38] sm:$0xff]  ;;  %s1819_s14 = smov 48   ;;  %s1820_s30 = smov 112   ;;  %vm536_vm3 = vcmask 130112  }
  0x30   : > { %323 = vmatpush.msra.mxu1 %v281_v4  ;;  %v270_v11 = vld [vmem:[#allocation6 + $0x10] sm:$0xff]  ;;  %v273_v12 = vld [vmem:[#allocation6 + $0x28] sm:$0xff]  ;;  %v268_v13 = vld [vmem:[#allocation6] sm:$0xff]  ;;  %s1821_s7 = smov 88   ;;  %s1822_s8 = smov 8   ;;  %vm643_vm4 = vcmask 195712  }
  0x31   : > { %301 = vmatpush.msra.mxu0 %v278_v2  ;;  %v263_v14 = vld [vmem:[%s1963_s21] sm:$0xff]  ;;  %v264_v15 = vld [vmem:[%s1963_s21 + $0x8] sm:$0xff]  ;;  %s1823_s9 = smov 16   ;;  %s1824_s10 = smov 80   ;;  %vm750_vm5 = vcmask 261312   ;;  %vm857_vm6 = vcmask 326912  }
  0x32   : > { %324 = vmatpush.msra.mxu1 %v279_v6  ;;  %v271_v16 = vld [vmem:[#allocation6 + $0x18] sm:$0xff]  ;;  %v269_v17 = vld [vmem:[#allocation6 + $0x8] sm:$0xff]  ;;  %s1825_s11 = smov 24   ;;  %s1826_s12 = smov 32   ;;  %vm964_vm7 = vcmask 392512   ;;  %vm1071_vm8 = vcmask 458112  }
  0x33   : > { %302 = vmatpush.msra.mxu0 %v276_v5  ;;  %s1827_s5 = smov 96   ;;  %s1828_s21 = smov 72   ;;  %vm1178_vm9 = vcmask 523712  }
  0x34   : > { %325 = vmatpush.msra.mxu1 %v277_v8 }
  0x35   : > { %303 = vmatpush.msra.mxu0 %v274_v7 }
  0x36   : > { %326 = vmatpush.msra.mxu1 %v275_v10 }
  0x37   : > { %304 = vmatpush.msra.mxu0 %v272_v9 }
  0x38   : > { %327 = vmatpush.msra.mxu1 %v273_v12 }
  0x39   : > { %305 = vmatpush.msra.mxu0 %v270_v11 }
  0x3a   : > { %328 = vmatpush.msra.mxu1 %v271_v16 }
  0x3b   : > { %306 = vmatpush.msra.mxu0 %v268_v13 }
  0x3c   : > { %1364 = vmatmul.msk.f32.vlgmr.msra.gmra.mxu0 %vm284_vm0, %v263_v14  ;;  %329 = vmatpush.msra.mxu1 %v269_v17 }
  0x3d   : > { %1366 = vmatmul.msk.f32.vlgmr.msra.gmra.mxu1 %vm284_vm0, %v263_v14 }
  0x44   : > { %1365 = vmatmul.msk.f32.gmra.mxu0 %vm284_vm0, %v264_v15 }
  0x45   : > { %1367 = vmatmul.msk.f32.gmra.mxu1 %vm284_vm0, %v264_v15 }
  0xb9   : > { %v1979_v18 = vpop.f32.mrf.mxu0 }
  0xba   : > { %430 = vrot.lane.b32.xlu2 %v1979_v18, %s1814_s1  ;;  %v2007_v20 = vpop.f32.mrf.mxu1 }
  0xc1   : > { %v1983_v19 = vpop.f32.mrf.mxu0 }
  0xc2   : > { %646 = vrot.lane.b32.xlu2 %v1979_v18, %s1815_s23  ;;  %341 = vrot.lane.b32.xlu0 %v1983_v19, %s1816_s24  ;;  %v2011_v21 = vpop.f32.mrf.mxu1 }
  0xc3   : > { %418 = vmatpush.msra.mxu3 %v2011_v21  ;;  %v2089_v10 = vpack.i.bf16 %v2007_v20, %v2011_v21 }
  0xc5   : > { %419 = vmatpush.msra.mxu3 %v2007_v20 }
  0xca   : > { %339 = vrot.lane.b32.xlu0 %v1979_v18, %s1816_s24  ;;  %s262_s24 = scalar_lea.vmem [#allocation9], %s1360_s28 }
  0xd2   : > { %436 = vrot.lane.b32.xlu0 %v1983_v19, %s1817_s29 }
  0xda   : > { %432 = vrot.lane.b32.xlu0 %v1983_v19, %s1814_s1 }
  0xe2   : > { %652 = vrot.lane.b32.xlu0 %v1983_v19, %s1818_s13 }
  0xea   : > { %650 = vrot.lane.b32.xlu0 %v1979_v18, %s1818_s13 }
  0xf2   : > { %543 = vrot.lane.b32.xlu0 %v1979_v18, %s1819_s14 }
  0xfa   : > { %539 = vrot.lane.b32.xlu0 %v1979_v18, %s1820_s30 }
 0x102   : > { %541 = vrot.lane.b32.xlu0 %v1983_v19, %s1820_s30 }
 0x10a   : > { %862 = vrot.lane.b32.xlu0 %v1983_v19, %s1821_s7 }
 0x112   : > { %1078 = vrot.lane.b32.xlu0 %v1979_v18, %s1822_s8 }
 0x114   : > { %v431_v47 = vpop.permute.xlu2 %430 }
 0x11a   : > { %973 = vrot.lane.b32.xlu0 %v1983_v19, %s1823_s9 }
 0x11c   : > { %v647_v48 = vpop.permute.xlu2 %646 }
 0x122   : > { %967 = vrot.lane.b32.xlu0 %v1979_v18, %s1824_s10 }
 0x134   : > { %v342_v22 = vpop.permute.xlu0 %341 }
 0x135   : > { %1368 = vmatpush.xpose.msk.msra.mxu2 %vm343_vm1, %v342_v22 }
 0x13c   : > { %v340_v23 = vpop.permute.xlu0 %339 }
 0x13d   : > { %1369 = vmatpush.xpose.msk.msra.mxu2 %vm343_vm1, %v340_v23 }
 0x140   : > { %1370 = vmatmul.msk.f32.vlgmr.msra.gmra.mxu2 %vm343_vm1, %v1979_v18 }
 0x144   : > { %v437_v24 = vpop.permute.xlu0 %436 }
 0x145   : > { %1374 = vmatpush.xpose.msk.msrb.mxu3 %vm343_vm1, %v437_v24 }
 0x148   : > { %1371 = vmatmul.msk.f32.gmra.mxu2 %vm343_vm1, %v1983_v19 }
 0x14c   : > { %v433_v29 = vpop.permute.xlu0 %432 }
 0x154   : > { %v653_v33 = vpop.permute.xlu0 %652 }
 0x15c   : > { %v651_v39 = vpop.permute.xlu0 %650 }
 0x164   : > { %v544_v42 = vpop.permute.xlu0 %543 }
 0x16c   : > { %v540_v44 = vpop.permute.xlu0 %539 }
 0x174   : > { %v542_v46 = vpop.permute.xlu0 %541 }
 0x17c   : > { %v863_v57 = vpop.permute.xlu0 %862 }
 0x184   : > { %v1079_v60 = vpop.permute.xlu0 %1078 }
 0x18c   : > { %v974_v63 = vpop.permute.xlu0 %973 }
 0x194   : > { %v968_v9 = vpop.permute.xlu0 %967 }
 0x1c3   : > { %v369_v25 = vpop.f32.mrf.mxu2 }
 0x1c4   : > { %v376_v26 = vsel %vm375_vm2, %v369_v25, -inf }
 0x1c5   : > { %377 = vmax.xlane.f32.xlu1 %v376_v26 }
 0x1cb   : > { %v372_v27 = vpop.f32.mrf.mxu2 }
 0x1cc   : > { %v379_v28 = vsel %vm375_vm2, %v372_v27, -inf }
 0x1cd   : > { %380 = vmax.xlane.f32.xlu1 %v379_v28 }
 0x1e6   : > { %434 = vrot.lane.b32.xlu1 %v1979_v18, %s1817_s29 }
 0x1ee   : > { %545 = vrot.lane.b32.xlu1 %v1983_v19, %s1819_s14 }
 0x1f6   : > { %866 = vrot.lane.b32.xlu1 %v1983_v19, %s1825_s11 }
 0x1fe   : > { %860 = vrot.lane.b32.xlu1 %v1979_v18, %s1821_s7 }
 0x206   : > { %757 = vrot.lane.b32.xlu1 %v1979_v18, %s1826_s12 }
 0x20e   : > { %753 = vrot.lane.b32.xlu1 %v1979_v18, %s1827_s5 }
 0x216   : > { %755 = vrot.lane.b32.xlu1 %v1983_v19, %s1827_s5 }
 0x21e   : > { %1076 = vrot.lane.b32.xlu1 %v1983_v19, %s1828_s21 }
 0x238   : > { %v378_v30 = vpop.xlane.xlu1 %377 }
 0x239   : > { %v382_v31 = vsub.f32 %v369_v25, %v378_v30 }
 0x23b   : > { %v384_v32 = vmul.f32 1.442695, %v382_v31 }
 0x23d   : > { %1566 = vpow2.f32 %v384_v32 }
 0x240   : > { %v381_v34 = vpop.xlane.xlu1 %380 }
 0x241   : > { %v383_v35 = vsub.f32 %v372_v27, %v381_v34 }
 0x243   : > { %v1567_v36 = vpop.eup %1566  ;;  %v386_v37 = vmul.f32 1.442695, %v383_v35 }
 0x244   : > { %v388_v38 = vsel %vm375_vm2, %v1567_v36, 0.0 }
 0x245   : > { %1568 = vpow2.f32 %v386_v37  ;;  %389 = vadd.xlane.f32.xlu2 %v388_v38 }
 0x24b   : > { %v1569_v40 = vpop.eup %1568 }
 0x24c   : > { %v391_v41 = vsel %vm375_vm2, %v1569_v40, 0.0 }
 0x24d   : > { %392 = vadd.xlane.f32.xlu2 %v391_v41 }
 0x258   : > { %v435_v43 = vpop.permute.xlu1 %434 }
 0x259   : > { %1375 = vmatpush.xpose.msk.msrb.mxu3 %vm343_vm1, %v435_v43 }
 0x260   : > { %v546_v45 = vpop.permute.xlu1 %545 }
 0x261   : > { %1380 = vmatpush.xpose.msk.msrb.mxu0 %vm343_vm1, %v546_v45  ;;  %1425 = vmatpush.xpose.msk.msrb.mxu1 %vm343_vm1, %v546_v45 }
 0x265   : > { %648 = vrot.lane.b32.xlu2 %v1983_v19, %s1815_s23  ;;  %1381 = vmatpush.xpose.msk.msrb.mxu0 %vm343_vm1, %v544_v42 }
 0x266   : > { %1426 = vmatpush.xpose.msk.msrb.mxu1 %vm343_vm1, %v544_v42 }
 0x268   : > { %1382 = vmatmul.msk.f32.vlgmr.msrb.gmra.mxu0 %vm343_vm1, %v540_v44  ;;  %v867_v51 = vpop.permute.xlu1 %866 }
 0x269   : > { %1383 = vmatmul.msk.f32.vlgmr.msrb.gmra.mxu1 %vm343_vm1, %v542_v46 }
 0x26d   : > { %864 = vrot.lane.b32.xlu2 %v1979_v18, %s1825_s11 }
 0x270   : > { %v861_v58 = vpop.permute.xlu1 %860 }
 0x275   : > { %759 = vrot.lane.b32.xlu2 %v1983_v19, %s1826_s12 }
 0x278   : > { %v758_v61 = vpop.permute.xlu1 %757 }
 0x27d   : > { %1080 = vrot.lane.b32.xlu2 %v1983_v19, %s1822_s8 }
 0x280   : > { %v754_v0 = vpop.permute.xlu1 %753 }
 0x285   : > { %1074 = vrot.lane.b32.xlu2 %v1979_v18, %s1828_s21 }
 0x288   : > { %v756_v5 = vpop.permute.xlu1 %755 }
 0x28d   : > { %971 = vrot.lane.b32.xlu2 %v1979_v18, %s1823_s9 }
 0x290   : > { %v1077_v12 = vpop.permute.xlu1 %1076 }
 0x295   : > { %969 = vrot.lane.b32.xlu2 %v1983_v19, %s1824_s10 }
 0x2b8   : > { %v390_v49 = vpop.xlane.xlu2 %389 }
 0x2b9   : > { %1570 = vrcp.f32 %v390_v49 }
 0x2bf   : > { %v1571_v50 = vpop.eup %1570 }
 0x2c0   : > { %v393_v52 = vpop.xlane.xlu2 %392  ;;  %v396_v53 = vmul.f32 %v1571_v50, %v1567_v36 }
 0x2c1   : > { %1572 = vrcp.f32 %v393_v52 }
 0x2c2   : > { %1372 = vmatmul.msk.f32.vlgmr.msra.gmra.mxu3 %vm375_vm2, %v396_v53 }
 0x2c3   : > { %1386 = vmatpush.xpose.msk.msra.mxu3 %vm343_vm1, %v653_v33 }
 0x2c7   : > { %v1573_v54 = vpop.eup %1572  ;;  %1387 = vmatpush.xpose.msk.msra.mxu3 %vm343_vm1, %v651_v39 }
 0x2c8   : > { %v649_v55 = vpop.permute.xlu2 %648  ;;  %v397_v56 = vmul.f32 %v1573_v54, %v1569_v40 }
 0x2ca   : > { %1373 = vmatmul.msk.f32.gmra.mxu3 %vm375_vm2, %v397_v56 }
 0x2d0   : > { %v865_v59 = vpop.permute.xlu2 %864 }
 0x2d2   : > { %1376 = vmatmul.msk.f32.vlgmr.msrb.gmra.mxu3 %vm343_vm1, %v431_v47 }
 0x2d3   : > { %1398 = vmatpush.xpose.msk.msrb.mxu3 %vm343_vm1, %v867_v51 }
 0x2d7   : > { %1399 = vmatpush.xpose.msk.msrb.mxu3 %vm343_vm1, %v865_v59 }
 0x2d8   : > { %v760_v62 = vpop.permute.xlu2 %759 }
 0x2d9   : > { %1392 = vmatpush.xpose.msk.msra.mxu0 %vm343_vm1, %v760_v62 }
 0x2da   : > { %1377 = vmatmul.msk.f32.gmra.mxu3 %vm343_vm1, %v433_v29 }
 0x2dd   : > { %1393 = vmatpush.xpose.msk.msra.mxu0 %vm343_vm1, %v758_v61 }
 0x2e0   : > { %v1081_v1 = vpop.permute.xlu2 %1080  ;;  %1394 = vmatmul.msk.f32.vlgmr.msra.gmra.mxu0 %vm343_vm1, %v754_v0 }
 0x2e1   : > { %1404 = vmatpush.xpose.msk.msrb.mxu0 %vm343_vm1, %v974_v63 }
 0x2e2   : > { %1388 = vmatmul.msk.f32.vlgmr.msra.gmra.mxu3 %vm343_vm1, %v647_v48 }
 0x2e3   : > { %1410 = vmatpush.xpose.msk.msra.mxu3 %vm343_vm1, %v1081_v1 }
 0x2e5   : > { %v572_v2 = vpop.f32.mrf.mxu0 }
 0x2e6   : > { %v575_v3 = vpop.f32.mrf.mxu1  ;;  %v578_v4 = vsel %vm375_vm2, %v572_v2, -inf }
 0x2e7   : > { %1411 = vmatpush.xpose.msk.msra.mxu3 %vm343_vm1, %v1079_v60  ;;  %579 = vmax.xlane.f32.xlu1 %v578_v4  ;;  %v581_v6 = vsel %vm375_vm2, %v575_v3, -inf }
 0x2e8   : > { %582 = vmax.xlane.f32.xlu0 %v581_v6  ;;  %v1075_v7 = vpop.permute.xlu2 %1074  ;;  %1395 = vmatmul.msk.f32.gmra.mxu0 %vm343_vm1, %v756_v5 }
 0x2ea   : > { %1389 = vmatmul.msk.f32.gmra.mxu3 %vm343_vm1, %v649_v55 }
 0x2f0   : > { %v972_v8 = vpop.permute.xlu2 %971 }
 0x2f1   : > { %1405 = vmatpush.xpose.msk.msrb.mxu0 %vm343_vm1, %v972_v8 }
 0x2f2   : > { %1400 = vmatmul.msk.f32.vlgmr.msrb.gmra.mxu3 %vm343_vm1, %v861_v58 }
 0x2f4   : > { %1406 = vmatmul.msk.f32.vlgmr.msrb.gmra.mxu0 %vm343_vm1, %v968_v9 }
 0x2f8   : > { %v970_v11 = vpop.permute.xlu2 %969 }
 0x2fa   : > { %1401 = vmatmul.msk.f32.gmra.mxu3 %vm343_vm1, %v863_v57 }
 0x2fc   : > { %1407 = vmatmul.msk.f32.gmra.mxu0 %vm343_vm1, %v970_v11  ;;  %1531 = vrot.lane.b32.xlu0 %v2089_v10, %s1814_s1 }
 0x302   : > { %1412 = vmatmul.msk.f32.vlgmr.msra.gmra.mxu3 %vm343_vm1, %v1075_v7 }
 0x30a   : > { %1413 = vmatmul.msk.f32.gmra.mxu3 %vm343_vm1, %v1077_v12 }
 0x345   : > { %v421_v13 = vpop.f32.mrf.mxu3 }
 0x346   : > { %428 = vst.msk [vmem:[#allocation2] sm:$0xff] %vm343_vm1, %v421_v13 }
 0x34d   : > { %v424_v14 = vpop.f32.mrf.mxu3 }
 0x34e   : > { %429 = vst.msk [vmem:[#allocation2 + $0x8] sm:$0xff] %vm343_vm1, %v424_v14 }
 0x355   : > { %v2115_v32 = vpop.f32.mrf.mxu3 }
 0x356   : > { %v469_v41 = vsel %vm375_vm2, %v2115_v32, -inf }
 0x35a   : > { %v580_v19 = vpop.xlane.xlu1 %579 }
 0x35b   : > { %v584_v20 = vsub.f32 %v572_v2, %v580_v19  ;;  %v583_v23 = vpop.xlane.xlu0 %582 }
 0x35c   : > { %v585_v34 = vsub.f32 %v575_v3, %v583_v23 }
 0x35d   : > { %v786_v15 = vpop.f32.mrf.mxu0  ;;  %v586_v24 = vmul.f32 1.442695, %v584_v20  ;;  %v2119_v33 = vpop.f32.mrf.mxu3 }
 0x35e   : > { %v792_v16 = vsel %vm375_vm2, %v786_v15, -inf  ;;  %v588_v36 = vmul.f32 1.442695, %v585_v34  ;;  %v472_v55 = vsel %vm375_vm2, %v2119_v33, -inf }
 0x35f   : > { %793 = vmax.xlane.f32.xlu2 %v792_v16  ;;  %1574 = vpow2.f32 %v586_v24 }
 0x360   : > { %1576 = vpow2.f32 %v588_v36 }
 0x365   : > { %v2100_v17 = vpop.f32.mrf.mxu0  ;;  %v1575_v30 = vpop.eup %1574 }
 0x366   : > { %v795_v18 = vsel %vm375_vm2, %v2100_v17, -inf  ;;  %v590_v31 = vsel %vm375_vm2, %v1575_v30, 0.0  ;;  %v2121_v35 = vpop.f32.mrf.mxu3  ;;  %v1577_v38 = vpop.eup %1576 }
 0x367   : > { %796 = vmax.xlane.f32.xlu1 %v795_v18  ;;  %v593_v39 = vsel %vm375_vm2, %v1577_v38, 0.0  ;;  %v685_v42 = vsel %vm375_vm2, %v2121_v35, -inf }
 0x36e   : > { %v1532_v27 = vpop.permute.xlu0 %1531  ;;  %v2123_v37 = vpop.f32.mrf.mxu3 }
 0x36f   : > { %v1533_v28 = vunpack.i.l.bf16 %v1532_v27  ;;  %v1534_v29 = vunpack.i.h.bf16 %v1532_v27  ;;  %v688_v45 = vsel %vm375_vm2, %v2123_v37, -inf }
 0x371   : > { %v2104_v21 = vpop.f32.mrf.mxu0  ;;  %519 = vmatpush.msrb.mxu2 %v1533_v28 }
 0x372   : > { %v1006_v22 = vsel %vm375_vm2, %v2104_v21, -inf }
 0x373   : > { %1007 = vmax.xlane.f32.xlu1 %v1006_v22  ;;  %520 = vmatpush.msrb.mxu2 %v1534_v29 }
 0x376   : > { %v893_v40 = vpop.f32.mrf.mxu3 }
 0x377   : > { %v899_v44 = vsel %vm375_vm2, %v893_v40, -inf }
 0x379   : > { %v2108_v25 = vpop.f32.mrf.mxu0 }
 0x37a   : > { %v1009_v26 = vsel %vm375_vm2, %v2108_v25, -inf }
 0x37b   : > { %1010 = vmax.xlane.f32.xlu2 %v1009_v26 }
 0x37e   : > { %v2130_v43 = vpop.f32.mrf.mxu3 }
 0x37f   : > { %v902_v58 = vsel %vm375_vm2, %v2130_v43, -inf }
 0x383   : > { %591 = vadd.xlane.f32.xlu2 %v590_v31 }
 0x386   : > { %v2135_v46 = vpop.f32.mrf.mxu3 }
 0x387   : > { %v1113_v49 = vsel %vm375_vm2, %v2135_v46, -inf }
 0x38c   : > { %1536 = vrot.lane.b32.xlu1 %v2089_v10, %s1815_s23 }
 0x38e   : > { %v2139_v51 = vpop.f32.mrf.mxu3 }
 0x38f   : > { %v1116_v52 = vsel %vm375_vm2, %v2139_v51, -inf }
 0x39b   : > { %1541 = vrot.lane.b32.xlu2 %v2089_v10, %s1820_s30 }
 0x3b6   : > { %594 = vadd.xlane.f32.xlu1 %v593_v39 }
 0x3be   : > { %470 = vmax.xlane.f32.xlu1 %v469_v41 }
 0x3c4   : > { %686 = vmax.xlane.f32.xlu2 %v685_v42 }
 0x3c6   : > { %900 = vmax.xlane.f32.xlu1 %v899_v44 }
 0x3cc   : > { %689 = vmax.xlane.f32.xlu2 %v688_v45 }
 0x3d2   : > { %v794_v47 = vpop.xlane.xlu2 %793 }
 0x3d3   : > { %v798_v48 = vsub.f32 %v786_v15, %v794_v47 }
 0x3d4   : > { %1114 = vmax.xlane.f32.xlu2 %v1113_v49 }
 0x3d5   : > { %v800_v50 = vmul.f32 1.442695, %v798_v48 }
 0x3d7   : > { %1578 = vpow2.f32 %v800_v50 }
 0x3da   : > { %v2149_v56 = vpop.xlane.xlu1 %796 }
 0x3db   : > { %v799_v42 = vsub.f32 %v2100_v17, %v2149_v56 }
 0x3dc   : > { %1117 = vmax.xlane.f32.xlu2 %v1116_v52 }
 0x3dd   : > { %v2143_v53 = vpop.eup %1578  ;;  %v802_v48 = vmul.f32 1.442695, %v799_v42 }
 0x3de   : > { %v804_v54 = vsel %vm375_vm2, %v2143_v53, 0.0 }
 0x3df   : > { %805 = vadd.xlane.f32.xlu0 %v804_v54 }
 0x3e6   : > { %v1008_v59 = vpop.xlane.xlu1 %1007 }
 0x3e7   : > { %473 = vmax.xlane.f32.xlu0 %v472_v55  ;;  %v1012_v31 = vsub.f32 %v2104_v21, %v1008_v59 }
 0x3ee   : > { %v2151_v57 = vpop.xlane.xlu2 %1010 }
 0x3ef   : > { %903 = vmax.xlane.f32.xlu0 %v902_v58 }
 0x3f6   : > { %v592_v60 = vpop.xlane.xlu2 %591 }
 0x3f7   : > { %1580 = vrcp.f32 %v592_v60 }
 0x3fd   : > { %v1581_v63 = vpop.eup %1580 }
 0x3fe   : > { %v1537_v61 = vpop.permute.xlu1 %1536  ;;  %v1542_v62 = vpop.permute.xlu2 %1541  ;;  %v598_v4 = vmul.f32 %v1581_v63, %v1575_v30 }
 0x3ff   : > { %v1538_v0 = vunpack.i.l.bf16 %v1537_v61  ;;  %v1543_v1 = vunpack.i.l.bf16 %v1542_v62  ;;  %v1539_v2 = vunpack.i.h.bf16 %v1537_v61  ;;  %v1544_v3 = vunpack.i.h.bf16 %v1542_v62 }
 0x401   : > { %626 = vmatpush.msra.mxu1 %v1543_v1  ;;  %733 = vmatpush.msra.mxu2 %v1538_v0  ;;  %v1013_v1 = vsub.f32 %v2108_v25, %v2151_v57 }
 0x403   : > { %627 = vmatpush.msra.mxu1 %v1544_v3  ;;  %734 = vmatpush.msra.mxu2 %v1539_v2 }
 0x404   : > { %1384 = vmatmul.msk.f32.vlgmr.msra.gmra.mxu1 %vm375_vm2, %v598_v4  ;;  %v1016_v4 = vmul.f32 1.442695, %v1013_v1  ;;  %v1194_v1 = vld [vmem:[#allocation8 + $0x38] sm:$0xff] }
 0x405   : > { %1213 = vmatpush.msra.mxu0 %v1194_v1 }
 0x429   : > { %v595_v5 = vpop.xlane.xlu1 %594 }
 0x42a   : > { %1582 = vrcp.f32 %v595_v5 }
 0x430   : > { %v1583_v6 = vpop.eup %1582 }
 0x431   : > { %v471_v7 = vpop.xlane.xlu1 %470  ;;  %v599_v8 = vmul.f32 %v1583_v6, %v1577_v38 }
 0x432   : > { %v475_v9 = vsub.f32 %v2115_v32, %v471_v7 }
 0x433   : > { %1385 = vmatmul.msk.f32.gmra.mxu1 %vm375_vm2, %v599_v8 }
 0x434   : > { %v477_v11 = vmul.f32 1.442695, %v475_v9 }
 0x436   : > { %1584 = vpow2.f32 %v477_v11 }
 0x437   : > { %v687_v22 = vpop.xlane.xlu2 %686 }
 0x438   : > { %v691_v26 = vsub.f32 %v2121_v35, %v687_v22 }
 0x439   : > { %v901_v12 = vpop.xlane.xlu1 %900 }
 0x43a   : > { %v905_v13 = vsub.f32 %v893_v40, %v901_v12  ;;  %v693_v29 = vmul.f32 1.442695, %v691_v26 }
 0x43c   : > { %v2158_v14 = vpop.eup %1584  ;;  %v907_v15 = vmul.f32 1.442695, %v905_v13 }
 0x43d   : > { %v481_v16 = vsel %vm375_vm2, %v2158_v14, 0.0 }
 0x43e   : > { %1586 = vpow2.f32 %v907_v15  ;;  %482 = vadd.xlane.f32.xlu0 %v481_v16 }
 0x43f   : > { %v690_v28 = vpop.xlane.xlu2 %689 }
 0x440   : > { %v692_v35 = vsub.f32 %v2123_v37, %v690_v28 }
 0x442   : > { %v695_v40 = vmul.f32 1.442695, %v692_v35 }
 0x444   : > { %v2162_v18 = vpop.eup %1586 }
 0x445   : > { %v911_v19 = vsel %vm375_vm2, %v2162_v18, 0.0 }
 0x446   : > { %912 = vadd.xlane.f32.xlu2 %v911_v19 }
 0x447   : > { %v1115_v34 = vpop.xlane.xlu2 %1114 }
 0x448   : > { %v1119_v37 = vsub.f32 %v2135_v46, %v1115_v34 }
 0x44a   : > { %v1121_v50 = vmul.f32 1.442695, %v1119_v37 }
 0x44f   : > { %v1118_v44 = vpop.xlane.xlu2 %1117 }
 0x450   : > { %v1120_v47 = vsub.f32 %v2139_v51, %v1118_v44 }
 0x452   : > { %1546 = vrot.lane.b32.xlu0 %v2089_v10, %s1821_s7  ;;  %v2168_v20 = vpop.xlane.xlu0 %805  ;;  %v1123_v52 = vmul.f32 1.442695, %v1120_v47  ;;  %s1243_s7 = sshll.u32 %s262_s24, 4  ;;  %s1244_s7 = int_to_ptr.vmem [resolvable:$true] %s1243_s7 }
 0x45a   : > { %v474_v23 = vpop.xlane.xlu0 %473 }
 0x45b   : > { %v476_v24 = vsub.f32 %v2119_v33, %v474_v23  ;;  %v1014_v33 = vmul.f32 1.442695, %v1012_v31 }
 0x45d   : > { %v479_v27 = vmul.f32 1.442695, %v476_v24 }
 0x45e   : > { %1551 = vrot.lane.b32.xlu2 %v2089_v10, %s1827_s5  ;;  %s1740_s5 = scalar_lea.hbm %s2328_s4, 32 }
 0x45f   : > { %1588 = vpow2.f32 %v479_v27 }
 0x460   : > { %1590 = vpow2.f32 %v693_v29 }
 0x461   : > { %1592 = vpow2.f32 %v1014_v33 }
 0x462   : > { %v904_v36 = vpop.xlane.xlu0 %903  ;;  %1594 = vpow2.f32 %v695_v40 }
 0x463   : > { %v906_v39 = vsub.f32 %v2130_v43, %v904_v36 }
 0x465   : > { %v2174_v30 = vpop.eup %1588  ;;  %v909_v21 = vmul.f32 1.442695, %v906_v39 }
 0x466   : > { %v484_v32 = vsel %vm375_vm2, %v2174_v30, 0.0  ;;  %v2180_v38 = vpop.eup %1590 }
 0x467   : > { %485 = vadd.xlane.f32.xlu1 %v484_v32  ;;  %v697_v41 = vsel %vm375_vm2, %v2180_v38, 0.0  ;;  %v2187_v45 = vpop.eup %1592  ;;  %1596 = vpow2.f32 %v909_v21 }
 0x468   : > { %v1018_v43 = vsel %vm375_vm2, %v2187_v45, 0.0  ;;  %v2193_v49 = vpop.eup %1594  ;;  %1598 = vpow2.f32 %v802_v48 }
 0x469   : > { %v700_v54 = vsel %vm375_vm2, %v2193_v49, 0.0  ;;  %1600 = vpow2.f32 %v1121_v50 }
 0x46a   : > { %1602 = vpow2.f32 %v1123_v52 }
 0x46d   : > { %v2195_v17 = vpop.eup %1596 }
 0x46e   : > { %v914_v46 = vsel %vm375_vm2, %v2195_v17, 0.0  ;;  %v2201_v51 = vpop.eup %1598 }
 0x46f   : > { %698 = vadd.xlane.f32.xlu1 %v697_v41  ;;  %v2203_v55 = vpop.eup %1600  ;;  %v807_v58 = vsel %vm375_vm2, %v2201_v51, 0.0 }
 0x470   : > { %v2205_v56 = vpop.eup %1602  ;;  %v1125_v60 = vsel %vm375_vm2, %v2203_v55, 0.0 }
 0x471   : > { %v1128_v59 = vsel %vm375_vm2, %v2205_v56, 0.0 }
 0x477   : > { %1019 = vadd.xlane.f32.xlu1 %v1018_v43 }
 0x47c   : > { %701 = vadd.xlane.f32.xlu0 %v700_v54 }
 0x47f   : > { %915 = vadd.xlane.f32.xlu1 %v914_v46 }
 0x481   : > { %v629_v61 = vpop.f32.mrf.mxu1 }
 0x484   : > { %808 = vadd.xlane.f32.xlu0 %v807_v58 }
 0x487   : > { %1129 = vadd.xlane.f32.xlu2 %v1128_v59  ;;  %1126 = vadd.xlane.f32.xlu1 %v1125_v60 }
 0x498   : > { %1561 = vrot.lane.b32.xlu0 %v2089_v10, %s1824_s10  ;;  %s1231_s10 = scalar_lea.sflag [#allocation5], %s1957_s26 }
 0x49f   : > { %637 = vrot.lane.b32.xlu2 %v629_v61, %s1823_s9 }
 0x4a0   : > { %1556 = vrot.lane.b32.xlu1 %v2089_v10, %s1828_s21 }
 0x4b0   : > { %v632_v62 = vpop.f32.mrf.mxu1 }
 0x4b1   : > { %639 = vrot.lane.b32.xlu2 %v632_v62, %s1823_s9  ;;  %v483_v63 = vpop.xlane.xlu0 %482 }
 0x4b2   : > { %1604 = vrcp.f32 %v483_v63 }
 0x4b3   : > { %1606 = vrcp.f32 %v2168_v20 }
 0x4b4   : > { %1608 = vpow2.f32 %v1016_v4  ;;  %v1191_v4 = vld [vmem:[#allocation8 + $0x20] sm:$0xff] }
 0x4b8   : > { %v1605_v0 = vpop.eup %1604 }
 0x4b9   : > { %v913_v2 = vpop.xlane.xlu2 %912  ;;  %v489_v3 = vmul.f32 %v1605_v0, %v2158_v14  ;;  %v1607_v10 = vpop.eup %1606 }
 0x4ba   : > { %v812_v9 = vmul.f32 %v1607_v10, %v2143_v53  ;;  %v2225_v12 = vpop.eup %1608  ;;  %v1190_v10 = vld [vmem:[#allocation8 + $0x18] sm:$0xff] }
 0x4bb   : > { %1378 = vmatmul.msk.f32.vlgmr.msrb.gmra.mxu2 %vm375_vm2, %v489_v3  ;;  %v1021_v57 = vsel %vm375_vm2, %v2225_v12, 0.0  ;;  %v1192_v3 = vld [vmem:[#allocation8 + $0x28] sm:$0xff] }
 0x4c1   : > { %v1552_v5 = vpop.permute.xlu2 %1551 }
 0x4c2   : > { %v1553_v6 = vunpack.i.l.bf16 %v1552_v5  ;;  %v1554_v7 = vunpack.i.h.bf16 %v1552_v5 }
 0x4c4   : > { %840 = vmatpush.msrb.mxu1 %v1553_v6  ;;  %v1547_v8 = vpop.permute.xlu0 %1546  ;;  %v1189_v6 = vld [vmem:[#allocation8 + $0x10] sm:$0xff] }
 0x4c5   : > { %v1548_v11 = vunpack.i.l.bf16 %v1547_v8  ;;  %v1549_v25 = vunpack.i.h.bf16 %v1547_v8  ;;  %v1187_v8 = vld [vmem:[#allocation8] sm:$0xff] }
 0x4c6   : > { %841 = vmatpush.msrb.mxu1 %v1554_v7  ;;  %v1188_v7 = vld [vmem:[#allocation8 + $0x8] sm:$0xff] }
 0x4c7   : > { %1396 = vmatmul.msk.f32.vlgmr.msrb.gmra.mxu1 %vm375_vm2, %v812_v9  ;;  %947 = vmatpush.msrb.mxu2 %v1548_v11 }
 0x4c9   : > { %948 = vmatpush.msrb.mxu2 %v1549_v25 }
 0x4ca   : > { %1022 = vadd.xlane.f32.xlu1 %v1021_v57 }
 0x4da   : > { %v486_v13 = vpop.xlane.xlu1 %485 }
 0x4db   : > { %1610 = vrcp.f32 %v486_v13 }
 0x4e1   : > { %v1611_v14 = vpop.eup %1610 }
 0x4e2   : > { %v699_v15 = vpop.xlane.xlu1 %698  ;;  %v490_v16 = vmul.f32 %v1611_v14, %v2174_v30 }
 0x4e3   : > { %1612 = vrcp.f32 %v699_v15 }
 0x4e4   : > { %1379 = vmatmul.msk.f32.gmra.mxu2 %vm375_vm2, %v490_v16 }
 0x4e9   : > { %v1613_v53 = vpop.eup %1612 }
 0x4ea   : > { %v705_v19 = vmul.f32 %v1613_v53, %v2180_v38  ;;  %v1020_v22 = vpop.xlane.xlu1 %1019 }
 0x4ec   : > { %1390 = vmatmul.msk.f32.vlgmr.msra.gmra.mxu2 %vm375_vm2, %v705_v19 }
 0x4ef   : > { %v702_v20 = vpop.xlane.xlu0 %701 }
 0x4f0   : > { %1614 = vrcp.f32 %v702_v20 }
 0x4f1   : > { %1616 = vrcp.f32 %v913_v2  ;;  %v1193_v2 = vld [vmem:[#allocation8 + $0x30] sm:$0xff] }
 0x4f2   : > { %v916_v27 = vpop.xlane.xlu1 %915  ;;  %1214 = vmatpush.msra.mxu0 %v1193_v2 }
 0x4f4   : > { %1215 = vmatpush.msra.mxu0 %v1192_v3 }
 0x4f6   : > { %v1615_v23 = vpop.eup %1614  ;;  %1216 = vmatpush.msra.mxu0 %v1191_v4 }
 0x4f7   : > { %v809_v24 = vpop.xlane.xlu0 %808  ;;  %v706_v26 = vmul.f32 %v1615_v23, %v2193_v49  ;;  %v1617_v28 = vpop.eup %1616 }
 0x4f8   : > { %1618 = vrcp.f32 %v809_v24  ;;  %v919_v30 = vmul.f32 %v1617_v28, %v2162_v18  ;;  %1217 = vmatpush.msra.mxu0 %v1190_v10 }
 0x4f9   : > { %1391 = vmatmul.msk.f32.gmra.mxu2 %vm375_vm2, %v706_v26  ;;  %1620 = vrcp.f32 %v916_v27 }
 0x4fa   : > { %1622 = vrcp.f32 %v1020_v22  ;;  %v1127_v33 = vpop.xlane.xlu1 %1126  ;;  %v1130_v40 = vpop.xlane.xlu2 %1129  ;;  %1218 = vmatpush.msra.mxu0 %v1189_v6  ;;  %v1565_v22 = vld [vmem:[%s2327_s3] ss:$0 sm:$0xff] }
 0x4fb   : > { %1624 = vrcp.f32 %v1127_v33 }
 0x4fc   : > { %1626 = vrcp.f32 %v1130_v40  ;;  %1219 = vmatpush.msra.mxu0 %v1188_v7 }
 0x4fe   : > { %v1619_v29 = vpop.eup %1618  ;;  %1220 = vmatpush.msra.mxu0 %v1187_v8 }
 0x4ff   : > { %v813_v31 = vmul.f32 %v1619_v29, %v2201_v51  ;;  %v1621_v32 = vpop.eup %1620 }
 0x500   : > { %v920_v34 = vmul.f32 %v1621_v32, %v2195_v17  ;;  %v1623_v36 = vpop.eup %1622 }
 0x501   : > { %1397 = vmatmul.msk.f32.gmra.mxu1 %vm375_vm2, %v813_v31  ;;  %1402 = vmatmul.msk.f32.vlgmr.msrb.gmra.mxu2 %vm375_vm2, %v919_v30  ;;  %v1026_v18 = vmul.f32 %v1623_v36, %v2187_v45  ;;  %v1625_v21 = vpop.eup %1624 }
 0x502   : > { %v1133_v37 = vmul.f32 %v1625_v21, %v2203_v55  ;;  %v1627_v47 = vpop.eup %1626  ;;  %v638_v63 = vpop.permute.xlu2 %637 }
 0x503   : > { %v1134_v48 = vmul.f32 %v1627_v47, %v2205_v56 }
 0x509   : > { %1403 = vmatmul.msk.f32.gmra.mxu2 %vm375_vm2, %v920_v34 }
 0x50a   : > { %v1562_v35 = vpop.permute.xlu0 %1561 }
 0x50b   : > { %v1563_v38 = vunpack.i.l.bf16 %v1562_v35  ;;  %v1564_v39 = vunpack.i.h.bf16 %v1562_v35  ;;  %v640_v9 = vpop.permute.xlu2 %639 }
 0x50d   : > { %1054 = vmatpush.msra.mxu1 %v1563_v38 }
 0x50f   : > { %1055 = vmatpush.msra.mxu1 %v1564_v39 }
 0x510   : > { %1408 = vmatmul.msk.f32.vlgmr.msra.gmra.mxu1 %vm375_vm2, %v1026_v18 }
 0x512   : > { %v1557_v41 = vpop.permute.xlu1 %1556 }
 0x513   : > { %v1558_v42 = vunpack.i.l.bf16 %v1557_v41  ;;  %v1559_v44 = vunpack.i.h.bf16 %v1557_v41 }
 0x515   : > { %1161 = vmatpush.msra.mxu2 %v1558_v42 }
 0x517   : > { %1162 = vmatpush.msra.mxu2 %v1559_v44 }
 0x518   : > { %1414 = vmatmul.msk.f32.vlgmr.msra.gmra.mxu2 %vm375_vm2, %v1133_v37 }
 0x520   : > { %1415 = vmatmul.msk.f32.gmra.mxu2 %vm375_vm2, %v1134_v48 }
 0x53d   : > { %v1023_v45 = vpop.xlane.xlu1 %1022 }
 0x53e   : > { %1628 = vrcp.f32 %v1023_v45  ;;  %v522_v52 = vpop.f32.mrf.mxu2 }
 0x544   : > { %v1629_v43 = vpop.eup %1628  ;;  %v843_v49 = vpop.f32.mrf.mxu1 }
 0x545   : > { %851 = vrot.lane.b32.xlu0 %v843_v49, %s1826_s12  ;;  %v1027_v50 = vmul.f32 %v1629_v43, %v2225_v12 }
 0x547   : > { %1409 = vmatmul.msk.f32.gmra.mxu1 %vm375_vm2, %v1027_v50 }
 0x54d   : > { %530 = vrot.lane.b32.xlu0 %v522_v52, %s1822_s8 }
 0x567   : > { %v525_v17 = vpop.f32.mrf.mxu2 }
 0x56f   : > { %v736_v54 = vpop.f32.mrf.mxu2 }
 0x570   : > { %744 = vrot.lane.b32.xlu0 %v736_v54, %s1825_s11 }
 0x57c   : > { %v739_v46 = vpop.f32.mrf.mxu2 }
 0x57e   : > { %v846_v51 = vpop.f32.mrf.mxu1 }
 0x57f   : > { %853 = vrot.lane.b32.xlu2 %v846_v51, %s1826_s12 }
 0x584   : > { %v950_v55 = vpop.f32.mrf.mxu2 }
 0x585   : > { %958 = vrot.lane.b32.xlu1 %v950_v55, %s1818_s13 }
 0x58c   : > { %v953_v58 = vpop.f32.mrf.mxu2 }
 0x58d   : > { %v1057_v56 = vpop.f32.mrf.mxu1 }
 0x58e   : > { %1065 = vrot.lane.b32.xlu0 %v1057_v56, %s1819_s14 }
 0x596   : > { %532 = vrot.lane.b32.xlu0 %v525_v17, %s1822_s8 }
 0x59b   : > { %v1164_v59 = vpop.f32.mrf.mxu2 }
 0x59c   : > { %1172 = vrot.lane.b32.xlu2 %v1164_v59, %s1817_s29 }
 0x59e   : > { %746 = vrot.lane.b32.xlu0 %v739_v46, %s1825_s11 }
 0x5a3   : > { %v1167_v60 = vpop.f32.mrf.mxu2 }
 0x5a4   : > { %1174 = vrot.lane.b32.xlu2 %v1167_v60, %s1817_s29  ;;  %s1424_s29 = sshll.u32 %s1798_s18, 4 }
 0x5a5   : > { %s1242_s30 = scalar_lea.hbm %s2328_s4, %s1424_s29 }
 0x5a6   : > { %960 = vrot.lane.b32.xlu0 %v953_v58, %s1818_s13  ;;  %s1245_s9 = sshll.u32 %s1242_s30, 4  ;;  %s1246_s9 = int_to_ptr.hbm [resolvable:$true] %s1245_s9 }
 0x5a7   : > { %s1734_s11 = sshra.s32 %s1246_s9, 4  ;;  %s1735_s11 = int_to_ptr.hbm [resolvable:$true] %s1734_s11 }
 0x5a8   : > { %s1736_s28 = scalar_lea.hbm %s1735_s11, 16  ;;  %p1741_p11 = scmp.lt.s32.totalorder %s1735_s11, %s2328_s4 }
 0x5a9   : > { %p1737_p1 = scmp.ne.s32.totalorder %s1735_s11, %s1736_s28  ;;  %p1742_p12 = scmp.lt.s32.totalorder %s1740_s5, %s1736_s28 }
 0x5ab   : > { %p1738_p3 = pnand %p1737_p1, %p1934_p2  ;;  %p1743_p13 = por %p1742_p12, %p1741_p11 }
 0x5ad   : > { %p1739_p7 = pneg %p1738_p3 }
 0x5af   : > { %p1744_p0 = pnand %p1743_p13, %p1739_p7 }
 0x5b7   : > { %v852_v61 = vpop.permute.xlu0 %851 }
 0x5bf   : > { %v531_v62 = vpop.permute.xlu0 %530 }
 0x5c0   : > { %537 = vst.msk [vmem:[#allocation2] sm:$0xff] %vm536_vm3, %v531_v62 }
 0x5c1   : > { %644 = vst.msk [vmem:[#allocation2] sm:$0xff] %vm643_vm4, %v638_v63 }
 0x5c4   : > { %v1060_v0 = vpop.f32.mrf.mxu1 }
 0x5c5   : > { %1067 = vrot.lane.b32.xlu1 %v1060_v0, %s1819_s14 }
 0x5d9   : > { %v854_v12 = vpop.permute.xlu2 %853 }
 0x5e2   : > { %v745_v5 = vpop.permute.xlu0 %744 }
 0x5e3   : > { %751 = vst.msk [vmem:[#allocation2] sm:$0xff] %vm750_vm5, %v745_v5 }
 0x5e4   : > { %858 = vst.msk [vmem:[#allocation2] sm:$0xff] %vm857_vm6, %v852_v61 }
 0x5f6   : > { %v1173_v57 = vpop.permute.xlu2 %1172 }
 0x5f7   : > { %v959_v11 = vpop.permute.xlu1 %958 }
 0x5f8   : > { %965 = vst.msk [vmem:[#allocation2] sm:$0xff] %vm964_vm7, %v959_v11 }
 0x5fe   : > { %v1175_v19 = vpop.permute.xlu2 %1174 }
 0x600   : > { %v1066_v25 = vpop.permute.xlu0 %1065 }
 0x601   : > { %1072 = vst.msk [vmem:[#allocation2] sm:$0xff] %vm1071_vm8, %v1066_v25 }
 0x602   : > { %1179 = vst.msk [vmem:[#allocation2] sm:$0xff] %vm1178_vm9, %v1173_v57 }
 0x608   : > { %v533_v13 = vpop.permute.xlu0 %532 }
 0x609   : > { %538 = vst.msk [vmem:[#allocation2 + $0x8] sm:$0xff] %vm536_vm3, %v533_v13  ;;  %v1185_v14 = vld [vmem:[#allocation2] sm:$0xff] }
 0x60a   : > { %645 = vst.msk [vmem:[#allocation2 + $0x8] sm:$0xff] %vm643_vm4, %v640_v9  ;;  %1416 = vmatmul.msk.f32.vlgmr.msra.gmra.mxu0 %vm284_vm0, %v1185_v14 }
 0x610   : > { %v747_v15 = vpop.permute.xlu0 %746 }
 0x611   : > { %752 = vst.msk [vmem:[#allocation2 + $0x8] sm:$0xff] %vm750_vm5, %v747_v15 }
 0x612   : > { %859 = vst.msk [vmem:[#allocation2 + $0x8] sm:$0xff] %vm857_vm6, %v854_v12 }
 0x618   : > { %v961_v16 = vpop.permute.xlu0 %960 }
 0x619   : > { %966 = vst.msk [vmem:[#allocation2 + $0x8] sm:$0xff] %vm964_vm7, %v961_v16 }
 0x637   : > { %v1068_v53 = vpop.permute.xlu1 %1067 }
 0x638   : > { %1073 = vst.msk [vmem:[#allocation2 + $0x8] sm:$0xff] %vm1071_vm8, %v1068_v53 }
 0x639   : > { %1180 = vst.msk [vmem:[#allocation2 + $0x8] sm:$0xff] %vm1178_vm9, %v1175_v19 }
 0x640   : > { %v1186_v20 = vld [vmem:[#allocation2 + $0x8] sm:$0xff] }
 0x641   : > { %1417 = vmatmul.msk.f32.gmra.mxu0 %vm284_vm0, %v1186_v20 }
 0x687   : > { %v1222_v23 = vpop.f32.mrf.mxu0 }
 0x688   : > { %v1223_v24 = vadd.f32 %v1565_v22, %v1222_v23 }
 0x68a   : > { %1228 = vst.msk [vmem:[%s262_s24] sm:$0xff] %vm284_vm0, %v1223_v24 }
 0x6be   : > { %v1225_v26 = vpop.f32.mrf.mxu0 }
 0x6bf   : > { %v1226_v27 = vadd.f32 %v1565_v22, %v1225_v26 }
 0x6c1   : > { %1229 = vst.msk [vmem:[%s262_s24 + $0x8] sm:$0xff] %vm284_vm0, %v1226_v27 }
 0x6c2   : > { %1747 = shalt.err (!%p1744_p0)
}
 0x6c3   : > { %s1829_s26 = smov 128  }
 0x6c4   : > { %1437 = dma.vmem_to_hbm [thread:$0]  (%p1934_p2), %s1244_s7, 256, %s1246_s9, %s1231_s10, %s1829_s26, %s1829_s26, %s1822_s8  }
 0x6c5 PF: > { %s1260_s23 = sand.u32 1, %s1786_s15   ;;  %p1451_p4 = pnand %p1355_p10, %p1902_p5 }
 0x6c6   : > { %s1261_s24 = scalar_lea.sflag [#allocation5], %s1260_s23 }
 0x6c7   : > { %p1452_p6 = pneg %p1451_p4 }
 0x6c9   : > { %1781 = dma.done.wait (%p1452_p6), %s1261_s24, 256  }
 0x6ca   : > { %1783 = vsyncadd (%p1452_p6), %s1261_s24, 4294967040  ;;  %s21_s20 = sadd.s32 1, %s1806_s20   ;;  %s2338_s15 = smov %s1790_s16 }
 0x6cb   : > { %p18_p8 = scmp.ge.s32.totalorder %s21_s20, 4   ;;  %s2339_s16 = smov %s1794_s17 }
 0x6cc   : > { %s2340_s17 = smov %s1944_s6  ;;  %s2341_s18 = smov %s1802_s19 }
 0x6cd   : > { %s2342_s19 = smov %s2344_s22  ;;  %20 = sbr.rel (!%p18_p8) target bundleno = 9 (0x9), region = 95 }
 0x6d2   :  { %1267 = vsyncpa [#allocation4], 1 }
 0x6d3   :  { %1269 = vsyncpa [#allocation4 + $0x1], 1 }
 0x6d4   :  { %1270 = vsyncpa [#allocation7], 1 }
 0x6d5   :  { %1271 = vsyncpa [#allocation5], 1 }
 0x6d6   :  { %1273 = vsyncpa [#allocation5 + $0x1], 1 }

</bundles_post_ra>
